<compile_context>
chip_gen: v6e
topology: v6e:2x2x1
jax: 0.10.0
libtpu: 0.0.40
codegen_flags: <defaults>
</compile_context>

<pallas_src>
import functools

import jax
import jax.numpy as jnp
import numpy as np
from jax.experimental import pallas as pl
from jax.experimental.pallas import tpu as pltpu

_LN_EPS = 1e-5
_NEG_INF = -1e30   # additive bias: exp(-1e30 - m) == 0 in f32
_HEAD_PAD = 128    # lane-dense width for the 4-wide regression output


# ---------------------------------------------------------------------------
# small math helpers (kernel-side, all f32)
# ---------------------------------------------------------------------------
def _layernorm(v, g, b):
    # one-pass statistics: two independent cross-lane reductions instead of a
    # serialized mean -> mean((v-mu)^2) chain.
    mu = jnp.mean(v, axis=-1, keepdims=True)
    ms = jnp.mean(v * v, axis=-1, keepdims=True)
    var = ms - mu * mu
    return (v - mu) * jax.lax.rsqrt(var + _LN_EPS) * g + b


def _gelu_tanh(x):
    # tanh-approximate GELU (EUP tanh); |delta| vs exact erf GELU ~1e-3.
    c = 0.7978845608028654  # sqrt(2/pi)
    return 0.5 * x * (1.0 + jnp.tanh(c * (x + 0.044715 * x * x * x)))


def _sigmoid(z):
    ez = jnp.exp(-jnp.abs(z))
    r = pl.reciprocal(1.0 + ez, approx=True)
    return jnp.where(z >= 0.0, r, ez * r)


# ---------------------------------------------------------------------------
# fused kernel: one (batch_tile, layer) grid step
# ---------------------------------------------------------------------------
def _fused_kernel(x_ref, bias_ref,
                  ln1_g, ln1_b, wqkv, bqkv, wo, bo,
                  ln2_g, ln2_b, w1, b1, w2, b2,
                  hw1, hb1, hw2, hb2,
                  o_ref, xs_ref,
                  *, num_heads, head_dim, seq_len, batch_tile):
    """x_ref: (Bt*L, D) token slab for one batch tile (resident across the
    layer axis); bias_ref: (Bt*L, Bt*L) block-diagonal additive bias combining
    the key-padding mask and the cross-batch-element mask.  Per-layer weights
    are streamed one layer per grid step.  xs_ref carries the residual stream
    across the layer axis.  Dropouts are identity (eval mode)."""
    layer = pl.program_id(1)
    last = pl.num_programs(1) - 1
    dh = head_dim
    M = batch_tile * seq_len

    @pl.when(layer == 0)
    def _():
        xs_ref[...] = x_ref[...]

    x = xs_ref[...]                       # (M, D) f32 residual stream
    bias = bias_ref[...]                  # (M, M) f32, loaded once per step
    D = x.shape[1]

    # --- self-attention sub-block -------------------------------------------
    x1 = _layernorm(x, ln1_g[...], ln1_b[...])
    qkv = jnp.dot(x1.astype(jnp.bfloat16), wqkv[...],
                  preferred_element_type=jnp.float32) + bqkv[...]   # (M, 3D)
    attn = None
    for h in range(num_heads):            # unrolled, H is small
        qh = qkv[:, h * dh:(h + 1) * dh].astype(jnp.bfloat16)
        kh = qkv[:, D + h * dh:D + (h + 1) * dh].astype(jnp.bfloat16)
        vh = qkv[:, 2 * D + h * dh:2 * D + (h + 1) * dh].astype(jnp.bfloat16)
        s = jax.lax.dot_general(qh, kh, (((1,), (1,)), ((), ())),
                                preferred_element_type=jnp.float32)  # (M, M)
        s = s + bias                       # key padding + block-diagonal mask
        m = jnp.max(s, axis=-1, keepdims=True)
        e = jnp.exp(s - m)
        inv = pl.reciprocal(jnp.sum(e, axis=-1, keepdims=True), approx=True)
        p = (e * inv).astype(jnp.bfloat16)
        oh = jnp.dot(p, vh, preferred_element_type=jnp.float32)     # (M, dh)
        # accumulate through the per-head row-block of the output projection
        # (sublane-aligned weight slice, no lane-offset concat/writes)
        contrib = jnp.dot(oh.astype(jnp.bfloat16), wo[h],
                          preferred_element_type=jnp.float32)
        attn = contrib if attn is None else attn + contrib
    x = x + attn + bo[...]                 # residual

    # --- feed-forward sub-block ----------------------------------------------
    x2 = _layernorm(x, ln2_g[...], ln2_b[...])
    hdn = jnp.dot(x2.astype(jnp.bfloat16), w1[...],
                  preferred_element_type=jnp.float32) + b1[...]
    hdn = _gelu_tanh(hdn)
    x = x + jnp.dot(hdn.astype(jnp.bfloat16), w2[...],
                    preferred_element_type=jnp.float32) + b2[...]
    xs_ref[...] = x

    # --- regression MLP on the class tokens (rows 0, L, 2L, ...) -------------
    @pl.when(layer == last)
    def _():
        row = jax.lax.broadcasted_iota(jnp.int32, (batch_tile, M), 0)
        col = jax.lax.broadcasted_iota(jnp.int32, (batch_tile, M), 1)
        sel = (col == row * seq_len).astype(jnp.bfloat16)   # (Bt, M) one-hot
        x0 = jnp.dot(sel, x.astype(jnp.bfloat16),
                     preferred_element_type=jnp.float32)    # (Bt, D)
        h1 = jnp.maximum(
            jnp.dot(x0.astype(jnp.bfloat16), hw1[...],
                    preferred_element_type=jnp.float32) + hb1[...], 0.0)
        z = jnp.dot(h1.astype(jnp.bfloat16), hw2[...],
                    preferred_element_type=jnp.float32) + hb2[...]
        o_ref[...] = _sigmoid(z)            # (Bt, 128) lane-dense store


# ---------------------------------------------------------------------------
# pallas_call wrapper
# ---------------------------------------------------------------------------
_LAYER_W = ("ln1_g", "ln1_b", "wqkv", "bqkv", "wo", "bo",
            "ln2_g", "ln2_b", "w1", "b1", "w2", "b2")
_HEAD_W = ("hw1", "hb1", "hw2", "hb2")


def _layer_spec(arr):
    """Stream one layer's block per grid step (index follows the layer axis)."""
    rest = arr.shape[1:]
    nd = len(rest)
    return pl.BlockSpec((None,) + rest,
                        lambda bt, l, _nd=nd: (l,) + (0,) * _nd)


def _resident_spec(arr):
    """Full-array block, constant index across the whole grid."""
    nd = arr.ndim
    return pl.BlockSpec(arr.shape, lambda bt, l, _nd=nd: (0,) * _nd)


def _nbytes(a):
    return int(np.prod(a.shape)) * a.dtype.itemsize


def fused_regression_head_pallas(x, bias_mm, prepped, num_heads, batch_tile):
    """x: (B, L, D) tokens; bias_mm: (B_tiles, Bt*L, Bt*L) block-diag bias.
    Returns sigmoid outputs (B, 128) (first 4 lanes = CXCYWH box)."""
    B, L, D = x.shape
    Bt = batch_tile
    assert B % Bt == 0, "batch must be divisible by batch_tile"
    n_tiles = B // Bt
    M = Bt * L
    num_layers = prepped["ln1_g"].shape[0]
    dh = D // num_heads

    layer_ws = tuple(prepped[k] for k in _LAYER_W)
    head_ws = tuple(prepped[k] for k in _HEAD_W)
    x2d = x.reshape(B * L, D)

    in_specs = ([pl.BlockSpec((M, D), lambda bt, l: (bt, 0)),
                 pl.BlockSpec((None, M, M), lambda bt, l: (bt, 0, 0))]
                + [_layer_spec(w) for w in layer_ws]
                + [_resident_spec(w) for w in head_ws])
    out_spec = pl.BlockSpec((None, Bt, _HEAD_PAD), lambda bt, l: (bt, 0, 0))

    # explicit scoped-VMEM budget: double-buffered streamed layer weights +
    # resident head weights + activations/bias/output + intermediate headroom.
    per_layer = sum(_nbytes(w) // num_layers for w in layer_ws)
    resident = sum(_nbytes(w) for w in head_ws)
    act = (M * D + M * M + Bt * _HEAD_PAD) * 4
    interm = 10 * M * (4 * D) * 4
    need = 2 * per_layer + 2 * resident + 3 * act + interm
    vmem_limit = int(min(64 << 20, max(32 << 20, 2 * need)))

    out = pl.pallas_call(
        functools.partial(_fused_kernel, num_heads=num_heads, head_dim=dh,
                          seq_len=L, batch_tile=Bt),
        out_shape=jax.ShapeDtypeStruct((n_tiles, Bt, _HEAD_PAD), jnp.float32),
        grid=(n_tiles, num_layers),
        in_specs=in_specs,
        out_specs=out_spec,
        scratch_shapes=[pltpu.VMEM((M, D), jnp.float32)],   # residual carry
        compiler_params=pltpu.CompilerParams(
            dimension_semantics=("parallel", "arbitrary"),
            vmem_limit_bytes=vmem_limit),
    )(x2d, bias_mm, *layer_ws, *head_ws)
    return out.reshape(B, _HEAD_PAD)


# ---------------------------------------------------------------------------
# parameter preparation (host-side, once): lane-dense fused QKV (scale folded
# into Wq/bq), bf16 matmul weights, head output padded to 128 lanes.
# ---------------------------------------------------------------------------
def prepare_params(params, num_heads):
    stacked = {k: [] for k in _LAYER_W}
    for lp in params["layers"]:
        H, D, dh = lp["wq"].shape
        scale = 1.0 / float(dh) ** 0.5

        def dense_w(w):   # (H, D, dh) -> (D, H*dh); column block h == w[h]
            return jnp.transpose(w, (1, 0, 2)).reshape(D, H * dh)

        def dense_b(b):   # (H, 1, dh) -> (1, H*dh)
            return jnp.transpose(b, (1, 0, 2)).reshape(1, H * dh)

        wq = dense_w(lp["wq"]) * scale
        bq = dense_b(lp["bq"]) * scale
        wk, bk = dense_w(lp["wk"]), dense_b(lp["bk"])
        wv, bv = dense_w(lp["wv"]), dense_b(lp["bv"])
        stacked["wqkv"].append(
            jnp.concatenate([wq, wk, wv], axis=1).astype(jnp.bfloat16))
        stacked["bqkv"].append(
            jnp.concatenate([bq, bk, bv], axis=1).astype(jnp.float32))
        stacked["wo"].append(lp["wo"].astype(jnp.bfloat16))   # (H, dh, D)
        stacked["bo"].append(lp["bo"])
        stacked["ln1_g"].append(lp["ln1_g"])
        stacked["ln1_b"].append(lp["ln1_b"])
        stacked["ln2_g"].append(lp["ln2_g"])
        stacked["ln2_b"].append(lp["ln2_b"])
        stacked["w1"].append(lp["w1"].astype(jnp.bfloat16))
        stacked["b1"].append(lp["b1"])
        stacked["w2"].append(lp["w2"].astype(jnp.bfloat16))
        stacked["b2"].append(lp["b2"])
    prepped = {k: jnp.stack(v) for k, v in stacked.items()}

    head = params["head"]
    D = head["w1"].shape[0]
    hw2 = jnp.zeros((D, _HEAD_PAD), jnp.float32).at[:, :4].set(head["w2"])
    hb2 = jnp.zeros((1, _HEAD_PAD), jnp.float32).at[:, :4].set(head["b2"])
    prepped.update(hw1=head["w1"].astype(jnp.bfloat16), hb1=head["b1"],
                   hw2=hw2.astype(jnp.bfloat16), hb2=hb2,
                   token=params["token"])
    return prepped


# ---------------------------------------------------------------------------
# plain-JAX glue (mask building is host-side; everything else is jitted)
# ---------------------------------------------------------------------------
def positional_encoding(mask, dim):
    not_mask = jnp.logical_not(mask)
    embed = jnp.cumsum(not_mask.astype(jnp.float32), axis=1)           # (B, L)
    dim_t = jnp.arange(dim, dtype=jnp.float32)
    dim_t = 10000.0 ** (2.0 * jnp.floor(dim_t / 2.0) / dim)
    pos = embed[:, :, None] / dim_t                                    # (B, L, D)
    pos = jnp.stack((jnp.sin(pos[..., 0::2]), jnp.cos(pos[..., 1::2])), axis=3)
    return pos.reshape(pos.shape[0], pos.shape[1], -1)


def build_mask(B, N, E, sizes):
    mask = np.ones((B, 1 + N + E), dtype=bool)          # True = padded
    for idx, (num_nodes, num_edges) in enumerate(sizes):
        mask[idx, 0] = False
        mask[idx, 1:1 + num_nodes] = False
        mask[idx, 1 + N:1 + N + num_edges] = False
    return jnp.asarray(mask)


def _choose_batch_tile(B, L, target_rows=256):
    """Largest Bt dividing B with Bt*L <= target_rows (MXU row target)."""
    bt = max(1, min(B, target_rows // max(L, 1)))
    while B % bt:
        bt -= 1
    return bt


@functools.partial(jax.jit, static_argnames=("num_heads", "batch_tile"))
def _forward_jit(nodes, edges, mask, prepped, num_heads, batch_tile):
    B, N, D = nodes.shape
    tokens = jnp.concatenate([nodes, edges], axis=1)                  # (B, N+E, D)
    tokens = tokens + positional_encoding(mask[:, 1:], D)
    x = jnp.concatenate(
        [jnp.broadcast_to(prepped["token"], (B, 1, D)), tokens], axis=1)
    L = x.shape[1]
    Bt = batch_tile
    M = Bt * L
    n_tiles = B // Bt
    # block-diagonal additive bias per batch tile: key-padding bias on the
    # diagonal (same-element) blocks, -inf on cross-element blocks.
    kpb = jnp.where(mask, _NEG_INF, 0.0).astype(jnp.float32)          # (B, L)
    col = jnp.broadcast_to(kpb.reshape(n_tiles, 1, M), (n_tiles, M, M))
    elem = jnp.arange(M, dtype=jnp.int32) // L
    same = (elem[:, None] == elem[None, :])[None]                     # (1, M, M)
    bias_mm = jnp.where(same, col, _NEG_INF)                          # (T, M, M)
    out = fused_regression_head_pallas(x, bias_mm, prepped, num_heads, Bt)
    return out[:, :4]


def regression_head_forward(nodes, edges, sizes, params, num_heads,
                            batch_tile=None):
    """Mirrors RegressionHead.forward (eval mode). Returns normalized CXCYWH
    boxes of shape (B, 4); the BBoxes wrapper only attaches image-size
    metadata and is not reproduced here."""
    B, N, _ = nodes.shape
    E = edges.shape[1]
    L = 1 + N + E
    mask = build_mask(B, N, E, sizes)           # host numpy loop -> outside jit
    prepped = prepare_params(params, num_heads)
    if batch_tile is None:
        batch_tile = _choose_batch_tile(B, L)
    return _forward_jit(nodes, edges, mask, prepped, num_heads, batch_tile)


# ---------------------------------------------------------------------------
# pure-JAX reference (faithful to the PyTorch module; for correctness only)
# ---------------------------------------------------------------------------
def _reference_layer(x, bias, p, num_heads):
    _, _, D = x.shape
    dh = D // num_heads
    x1 = _layernorm(x, p["ln1_g"][0], p["ln1_b"][0])
    q = jnp.einsum("bld,hde->bhle", x1, p["wq"]) + p["bq"][None]
    k = jnp.einsum("bld,hde->bhle", x1, p["wk"]) + p["bk"][None]
    v = jnp.einsum("bld,hde->bhle", x1, p["wv"]) + p["bv"][None]
    s = jnp.einsum("bhqe,bhke->bhqk", q, k) / jnp.sqrt(float(dh))
    s = s + bias[:, :, None, :]
    a = jax.nn.softmax(s, axis=-1)
    o = jnp.einsum("bhqk,bhke->bhqe", a, v)
    attn = jnp.einsum("bhqe,hed->bqd", o, p["wo"]) + p["bo"][0]
    xr = x + attn
    x2 = _layernorm(xr, p["ln2_g"][0], p["ln2_b"][0])
    h = jax.nn.gelu(x2 @ p["w1"] + p["b1"][0], approximate=False)   # exact GELU
    return xr + h @ p["w2"] + p["b2"][0]


def reference_forward(nodes, edges, sizes, params, num_heads):
    B, N, D = nodes.shape
    E = edges.shape[1]
    tokens = jnp.concatenate([nodes, edges], axis=1)
    mask = build_mask(B, N, E, sizes)
    tokens = tokens + positional_encoding(mask[:, 1:], D)
    x = jnp.concatenate(
        [jnp.broadcast_to(params["token"], (B, 1, D)), tokens], axis=1)
    bias = jnp.where(mask, _NEG_INF, 0.0).astype(jnp.float32)[:, None, :]
    for lp in params["layers"]:
        x = _reference_layer(x, bias, lp, num_heads)
    x0 = x[:, 0, :]
    hp = params["head"]
    h = jnp.maximum(x0 @ hp["w1"] + hp["b1"][0], 0.0)
    return jax.nn.sigmoid(h @ hp["w2"] + hp["b2"][0])


# ---------------------------------------------------------------------------
# deterministic synthetic parameters (shapes follow the module __init__)
# ---------------------------------------------------------------------------
def init_params(key, dim, num_heads, num_layers):
    dh = dim // num_heads
    s = 0.05
    layers = []
    for _ in range(num_layers):
        key, *ks = jax.random.split(key, 13)
        layers.append(dict(
            ln1_g=jnp.ones((1, dim), jnp.float32),
            ln1_b=jnp.zeros((1, dim), jnp.float32),
            wq=s * jax.random.normal(ks[0], (num_heads, dim, dh), jnp.float32),
            bq=s * jax.random.normal(ks[1], (num_heads, 1, dh), jnp.float32),
            wk=s * jax.random.normal(ks[2], (num_heads, dim, dh), jnp.float32),
            bk=s * jax.random.normal(ks[3], (num_heads, 1, dh), jnp.float32),
            wv=s * jax.random.normal(ks[4], (num_heads, dim, dh), jnp.float32),
            bv=s * jax.random.normal(ks[5], (num_heads, 1, dh), jnp.float32),
            wo=s * jax.random.normal(ks[6], (num_heads, dh, dim), jnp.float32),
            bo=s * jax.random.normal(ks[7], (1, dim), jnp.float32),
            ln2_g=jnp.ones((1, dim), jnp.float32),
            ln2_b=jnp.zeros((1, dim), jnp.float32),
            w1=s * jax.random.normal(ks[8], (dim, 4 * dim), jnp.float32),
            b1=s * jax.random.normal(ks[9], (1, 4 * dim), jnp.float32),
            w2=s * jax.random.normal(ks[10], (4 * dim, dim), jnp.float32),
            b2=s * jax.random.normal(ks[11], (1, dim), jnp.float32),
        ))
    key, kt, k1, k2, k3, k4 = jax.random.split(key, 6)
    head = dict(
        w1=s * jax.random.normal(k1, (dim, dim), jnp.float32),
        b1=s * jax.random.normal(k2, (1, dim), jnp.float32),
        w2=s * jax.random.normal(k3, (dim, 4), jnp.float32),
        b2=s * jax.random.normal(k4, (1, 4), jnp.float32),
    )
    return dict(token=jax.random.normal(kt, (1, 1, dim), jnp.float32),
                layers=layers, head=head)


if __name__ == "__main__":
    B, N, E, D, H, NUM_LAYERS = 4, 3, 4, 32, 4, 2
    root = jax.random.PRNGKey(0)
    kp, kn, ke = jax.random.split(root, 3)
    params = init_params(kp, D, H, NUM_LAYERS)
    nodes = jax.random.normal(kn, (B, N, D), jnp.float32)   # graph.nodes(True)
    edges = jax.random.normal(ke, (B, E, D), jnp.float32)   # graph.edges(True)
    sizes = [(3, 4), (2, 3), (1, 2), (3, 1)]  # (num_nodes, num_edges)/sample
    # images_size only feeds BBoxes metadata in the original code; the forward
    # itself produces normalized CXCYWH boxes, which is what we return.

    # batch_tile=2 -> grid=(2 batch tiles, 2 layers): exercises the batch
    # tiling, the per-layer weight streaming and the scratch residual carry.
    boxes = regression_head_forward(nodes, edges, sizes, params, H,
                                    batch_tile=2)
    boxes = jax.block_until_ready(boxes)
    assert boxes.shape == (B, 4)

    ref = reference_forward(nodes, edges, sizes, params, H)
    np.testing.assert_allclose(np.asarray(boxes), np.asarray(ref),
                               rtol=2e-2, atol=2e-2)
    print("KERNEL_OK")
</pallas_src>

<mosaic_0001>
module attributes {stable_mosaic.version = 11 : i64} {
  func.func @_fused_kernel(%arg0: i32, %arg1: i32, %arg2: memref<16x32xf32, #tpu.memory_space<vmem>>, %arg3: memref<1x16x16xf32, #tpu.memory_space<vmem>>, %arg4: memref<1x1x32xf32, #tpu.memory_space<vmem>>, %arg5: memref<1x1x32xf32, #tpu.memory_space<vmem>>, %arg6: memref<1x32x96xbf16, #tpu.memory_space<vmem>>, %arg7: memref<1x1x96xf32, #tpu.memory_space<vmem>>, %arg8: memref<1x4x8x32xbf16, #tpu.memory_space<vmem>>, %arg9: memref<1x1x32xf32, #tpu.memory_space<vmem>>, %arg10: memref<1x1x32xf32, #tpu.memory_space<vmem>>, %arg11: memref<1x1x32xf32, #tpu.memory_space<vmem>>, %arg12: memref<1x32x128xbf16, #tpu.memory_space<vmem>>, %arg13: memref<1x1x128xf32, #tpu.memory_space<vmem>>, %arg14: memref<1x128x32xbf16, #tpu.memory_space<vmem>>, %arg15: memref<1x1x32xf32, #tpu.memory_space<vmem>>, %arg16: memref<32x32xbf16, #tpu.memory_space<vmem>>, %arg17: memref<1x32xf32, #tpu.memory_space<vmem>>, %arg18: memref<32x128xbf16, #tpu.memory_space<vmem>>, %arg19: memref<1x128xf32, #tpu.memory_space<vmem>>, %arg20: memref<1x2x128xf32, #tpu.memory_space<vmem>>, %arg21: memref<16x32xf32, #tpu.memory_space<vmem>>) attributes {dimension_semantics = [#tpu.dimension_semantics<parallel>, #tpu.dimension_semantics<arbitrary>], iteration_bounds = array<i64: 2, 2>, scalar_prefetch = 0 : i64, scratch_operands = 1 : i64, tpu.core_type = #tpu.core_type<tc>, window_params = [{transform_indices = @transform_0, window_bounds = array<i64: 16, 32>}, {transform_indices = @transform_1, window_bounds = array<i64: 1, 16, 16>}, {transform_indices = @transform_2, window_bounds = array<i64: 1, 1, 32>}, {transform_indices = @transform_3, window_bounds = array<i64: 1, 1, 32>}, {transform_indices = @transform_4, window_bounds = array<i64: 1, 32, 96>}, {transform_indices = @transform_5, window_bounds = array<i64: 1, 1, 96>}, {transform_indices = @transform_6, window_bounds = array<i64: 1, 4, 8, 32>}, {transform_indices = @transform_7, window_bounds = array<i64: 1, 1, 32>}, {transform_indices = @transform_8, window_bounds = array<i64: 1, 1, 32>}, {transform_indices = @transform_9, window_bounds = array<i64: 1, 1, 32>}, {transform_indices = @transform_10, window_bounds = array<i64: 1, 32, 128>}, {transform_indices = @transform_11, window_bounds = array<i64: 1, 1, 128>}, {transform_indices = @transform_12, window_bounds = array<i64: 1, 128, 32>}, {transform_indices = @transform_13, window_bounds = array<i64: 1, 1, 32>}, {pipeline_mode = #tpu.pipeline_mode<synchronous>, transform_indices = @transform_14, window_bounds = array<i64: 32, 32>}, {pipeline_mode = #tpu.pipeline_mode<synchronous>, transform_indices = @transform_15, window_bounds = array<i64: 1, 32>}, {pipeline_mode = #tpu.pipeline_mode<synchronous>, transform_indices = @transform_16, window_bounds = array<i64: 32, 128>}, {pipeline_mode = #tpu.pipeline_mode<synchronous>, transform_indices = @transform_17, window_bounds = array<i64: 1, 128>}, {transform_indices = @transform_18, window_bounds = array<i64: 1, 2, 128>}]} {
    %c0_i32 = arith.constant 0 : i32
    %0 = arith.cmpi eq, %arg1, %c0_i32 : i32
    %1 = arith.extui %0 : i1 to i32
    %c0_i32_0 = arith.constant 0 : i32
    %2 = arith.cmpi ne, %1, %c0_i32_0 : i32
    scf.if %2 {
      %c0_90 = arith.constant 0 : index
      %c0_91 = arith.constant 0 : index
      %204 = vector.load %arg2[%c0_90, %c0_91] : memref<16x32xf32, #tpu.memory_space<vmem>>, vector<16x32xf32>
      %c0_92 = arith.constant 0 : index
      %c0_93 = arith.constant 0 : index
      %205 = vector.load %arg21[%c0_92, %c0_93] : memref<16x32xf32, #tpu.memory_space<vmem>>, vector<16x32xf32>
      tpu.vector_store %arg21[%c0_92, %c0_93], %204 {strides = array<i32>} : memref<16x32xf32, #tpu.memory_space<vmem>>, vector<16x32xf32>,
    } else {
    }
    %c0 = arith.constant 0 : index
    %c0_1 = arith.constant 0 : index
    %3 = vector.load %arg21[%c0, %c0_1] : memref<16x32xf32, #tpu.memory_space<vmem>>, vector<16x32xf32>
    %c0_2 = arith.constant 0 : index
    %c0_3 = arith.constant 0 : index
    %c0_4 = arith.constant 0 : index
    %4 = vector.load %arg3[%c0_2, %c0_3, %c0_4] : memref<1x16x16xf32, #tpu.memory_space<vmem>>, vector<1x16x16xf32>
    %5 = vector.shape_cast %4 : vector<1x16x16xf32> to vector<16x16xf32>
    %c0_5 = arith.constant 0 : index
    %c0_6 = arith.constant 0 : index
    %c0_7 = arith.constant 0 : index
    %6 = vector.load %arg4[%c0_5, %c0_6, %c0_7] : memref<1x1x32xf32, #tpu.memory_space<vmem>>, vector<1x1x32xf32>
    %7 = vector.shape_cast %6 : vector<1x1x32xf32> to vector<1x32xf32>
    %c0_8 = arith.constant 0 : index
    %c0_9 = arith.constant 0 : index
    %c0_10 = arith.constant 0 : index
    %8 = vector.load %arg5[%c0_8, %c0_9, %c0_10] : memref<1x1x32xf32, #tpu.memory_space<vmem>>, vector<1x1x32xf32>
    %9 = vector.shape_cast %8 : vector<1x1x32xf32> to vector<1x32xf32>
    %cst = arith.constant dense<0.000000e+00> : vector<16xf32>
    %10 = vector.multi_reduction <add>, %3, %cst [1] : vector<16x32xf32> to vector<16xf32>
    %11 = vector.shape_cast %10 : vector<16xf32> to vector<16x1xf32>
    %cst_11 = arith.constant 3.200000e+01 : f32
    %12 = vector.broadcast %cst_11 : f32 to vector<16x1xf32>
    %13 = arith.divf %11, %12 : vector<16x1xf32>
    %14 = arith.mulf %3, %3 : vector<16x32xf32>
    %cst_12 = arith.constant dense<0.000000e+00> : vector<16xf32>
    %15 = vector.multi_reduction <add>, %14, %cst_12 [1] : vector<16x32xf32> to vector<16xf32>
    %16 = vector.shape_cast %15 : vector<16xf32> to vector<16x1xf32>
    %cst_13 = arith.constant 3.200000e+01 : f32
    %17 = vector.broadcast %cst_13 : f32 to vector<16x1xf32>
    %18 = arith.divf %16, %17 : vector<16x1xf32>
    %19 = arith.mulf %13, %13 : vector<16x1xf32>
    %20 = arith.subf %18, %19 : vector<16x1xf32>
    %21 = vector.broadcast %13 : vector<16x1xf32> to vector<16x32xf32>
    %22 = arith.subf %3, %21 : vector<16x32xf32>
    %cst_14 = arith.constant 9.99999974E-6 : f32
    %23 = vector.broadcast %cst_14 : f32 to vector<16x1xf32>
    %24 = arith.addf %20, %23 : vector<16x1xf32>
    %25 = math.rsqrt %24 : vector<16x1xf32>
    %26 = vector.broadcast %25 : vector<16x1xf32> to vector<16x32xf32>
    %27 = arith.mulf %22, %26 : vector<16x32xf32>
    %28 = vector.broadcast %7 : vector<1x32xf32> to vector<16x32xf32>
    %29 = arith.mulf %27, %28 : vector<16x32xf32>
    %30 = vector.broadcast %9 : vector<1x32xf32> to vector<16x32xf32>
    %31 = arith.addf %29, %30 : vector<16x32xf32>
    %32 = arith.truncf %31 : vector<16x32xf32> to vector<16x32xbf16>
    %c0_15 = arith.constant 0 : index
    %c0_16 = arith.constant 0 : index
    %c0_17 = arith.constant 0 : index
    %33 = vector.load %arg6[%c0_15, %c0_16, %c0_17] : memref<1x32x96xbf16, #tpu.memory_space<vmem>>, vector<1x32x96xbf16>
    %34 = vector.shape_cast %33 : vector<1x32x96xbf16> to vector<32x96xbf16>
    %cst_18 = arith.constant dense<0.000000e+00> : vector<16x96xf32>
    %35 = tpu.matmul %32, %34, %cst_18 {dimension_numbers = #tpu.dot_dimension_numbers<[1], [0], [0], [1], [0, 0, 1, 1], [], []>} : vector<16x32xbf16>, vector<32x96xbf16>, vector<16x96xf32> -> vector<16x96xf32>
    %c0_19 = arith.constant 0 : index
    %c0_20 = arith.constant 0 : index
    %c0_21 = arith.constant 0 : index
    %36 = vector.load %arg7[%c0_19, %c0_20, %c0_21] : memref<1x1x96xf32, #tpu.memory_space<vmem>>, vector<1x1x96xf32>
    %37 = vector.shape_cast %36 : vector<1x1x96xf32> to vector<1x96xf32>
    %38 = vector.broadcast %37 : vector<1x96xf32> to vector<16x96xf32>
    %39 = arith.addf %35, %38 : vector<16x96xf32>
    %40 = vector.extract_strided_slice %39 {offsets = [0, 0], sizes = [16, 8], strides = [1, 1]} : vector<16x96xf32> to vector<16x8xf32>
    %41 = arith.truncf %40 : vector<16x8xf32> to vector<16x8xbf16>
    %42 = vector.extract_strided_slice %39 {offsets = [0, 32], sizes = [16, 8], strides = [1, 1]} : vector<16x96xf32> to vector<16x8xf32>
    %43 = arith.truncf %42 : vector<16x8xf32> to vector<16x8xbf16>
    %44 = vector.extract_strided_slice %39 {offsets = [0, 64], sizes = [16, 8], strides = [1, 1]} : vector<16x96xf32> to vector<16x8xf32>
    %45 = arith.truncf %44 : vector<16x8xf32> to vector<16x8xbf16>
    %cst_22 = arith.constant dense<0.000000e+00> : vector<16x16xf32>
    %46 = tpu.matmul %41, %43, %cst_22 {dimension_numbers = #tpu.dot_dimension_numbers<[1], [1], [0], [0], [0, 0, 1, 0], [], []>} : vector<16x8xbf16>, vector<16x8xbf16>, vector<16x16xf32> -> vector<16x16xf32>
    %47 = arith.addf %46, %5 : vector<16x16xf32>
    %cst_23 = arith.constant dense<0xFF800000> : vector<16xf32>
    %48 = vector.multi_reduction <maximumf>, %47, %cst_23 [1] : vector<16x16xf32> to vector<16xf32>
    %49 = vector.shape_cast %48 : vector<16xf32> to vector<16x1xf32>
    %50 = vector.broadcast %49 : vector<16x1xf32> to vector<16x16xf32>
    %51 = arith.subf %47, %50 : vector<16x16xf32>
    %52 = math.exp %51 : vector<16x16xf32>
    %cst_24 = arith.constant dense<0.000000e+00> : vector<16xf32>
    %53 = vector.multi_reduction <add>, %52, %cst_24 [1] : vector<16x16xf32> to vector<16xf32>
    %54 = vector.shape_cast %53 : vector<16xf32> to vector<16x1xf32>
    %55 = tpu.reciprocal %54 {approx = true} : vector<16x1xf32> -> vector<16x1xf32>
    %56 = vector.broadcast %55 : vector<16x1xf32> to vector<16x16xf32>
    %57 = arith.mulf %52, %56 : vector<16x16xf32>
    %58 = arith.truncf %57 : vector<16x16xf32> to vector<16x16xbf16>
    %cst_25 = arith.constant dense<0.000000e+00> : vector<16x8xf32>
    %59 = tpu.matmul %58, %45, %cst_25 {dimension_numbers = #tpu.dot_dimension_numbers<[1], [0], [0], [1], [0, 0, 1, 1], [], []>} : vector<16x16xbf16>, vector<16x8xbf16>, vector<16x8xf32> -> vector<16x8xf32>
    %60 = arith.truncf %59 : vector<16x8xf32> to vector<16x8xbf16>
    %c0_26 = arith.constant 0 : index
    %c0_27 = arith.constant 0 : index
    %c0_28 = arith.constant 0 : index
    %c0_29 = arith.constant 0 : index
    %61 = vector.load %arg8[%c0_26, %c0_27, %c0_28, %c0_29] : memref<1x4x8x32xbf16, #tpu.memory_space<vmem>>, vector<1x1x8x32xbf16>
    %62 = vector.shape_cast %61 : vector<1x1x8x32xbf16> to vector<8x32xbf16>
    %cst_30 = arith.constant dense<0.000000e+00> : vector<16x32xf32>
    %63 = tpu.matmul %60, %62, %cst_30 {dimension_numbers = #tpu.dot_dimension_numbers<[1], [0], [0], [1], [0, 0, 1, 1], [], []>} : vector<16x8xbf16>, vector<8x32xbf16>, vector<16x32xf32> -> vector<16x32xf32>
    %64 = vector.extract_strided_slice %39 {offsets = [0, 8], sizes = [16, 8], strides = [1, 1]} : vector<16x96xf32> to vector<16x8xf32>
    %65 = arith.truncf %64 : vector<16x8xf32> to vector<16x8xbf16>
    %66 = vector.extract_strided_slice %39 {offsets = [0, 40], sizes = [16, 8], strides = [1, 1]} : vector<16x96xf32> to vector<16x8xf32>
    %67 = arith.truncf %66 : vector<16x8xf32> to vector<16x8xbf16>
    %68 = vector.extract_strided_slice %39 {offsets = [0, 72], sizes = [16, 8], strides = [1, 1]} : vector<16x96xf32> to vector<16x8xf32>
    %69 = arith.truncf %68 : vector<16x8xf32> to vector<16x8xbf16>
    %cst_31 = arith.constant dense<0.000000e+00> : vector<16x16xf32>
    %70 = tpu.matmul %65, %67, %cst_31 {dimension_numbers = #tpu.dot_dimension_numbers<[1], [1], [0], [0], [0, 0, 1, 0], [], []>} : vector<16x8xbf16>, vector<16x8xbf16>, vector<16x16xf32> -> vector<16x16xf32>
    %71 = arith.addf %70, %5 : vector<16x16xf32>
    %cst_32 = arith.constant dense<0xFF800000> : vector<16xf32>
    %72 = vector.multi_reduction <maximumf>, %71, %cst_32 [1] : vector<16x16xf32> to vector<16xf32>
    %73 = vector.shape_cast %72 : vector<16xf32> to vector<16x1xf32>
    %74 = vector.broadcast %73 : vector<16x1xf32> to vector<16x16xf32>
    %75 = arith.subf %71, %74 : vector<16x16xf32>
    %76 = math.exp %75 : vector<16x16xf32>
    %cst_33 = arith.constant dense<0.000000e+00> : vector<16xf32>
    %77 = vector.multi_reduction <add>, %76, %cst_33 [1] : vector<16x16xf32> to vector<16xf32>
    %78 = vector.shape_cast %77 : vector<16xf32> to vector<16x1xf32>
    %79 = tpu.reciprocal %78 {approx = true} : vector<16x1xf32> -> vector<16x1xf32>
    %80 = vector.broadcast %79 : vector<16x1xf32> to vector<16x16xf32>
    %81 = arith.mulf %76, %80 : vector<16x16xf32>
    %82 = arith.truncf %81 : vector<16x16xf32> to vector<16x16xbf16>
    %cst_34 = arith.constant dense<0.000000e+00> : vector<16x8xf32>
    %83 = tpu.matmul %82, %69, %cst_34 {dimension_numbers = #tpu.dot_dimension_numbers<[1], [0], [0], [1], [0, 0, 1, 1], [], []>} : vector<16x16xbf16>, vector<16x8xbf16>, vector<16x8xf32> -> vector<16x8xf32>
    %84 = arith.truncf %83 : vector<16x8xf32> to vector<16x8xbf16>
    %c0_35 = arith.constant 0 : index
    %c1 = arith.constant 1 : index
    %c0_36 = arith.constant 0 : index
    %c0_37 = arith.constant 0 : index
    %85 = vector.load %arg8[%c0_35, %c1, %c0_36, %c0_37] : memref<1x4x8x32xbf16, #tpu.memory_space<vmem>>, vector<1x1x8x32xbf16>
    %86 = vector.shape_cast %85 : vector<1x1x8x32xbf16> to vector<8x32xbf16>
    %cst_38 = arith.constant dense<0.000000e+00> : vector<16x32xf32>
    %87 = tpu.matmul %84, %86, %cst_38 {dimension_numbers = #tpu.dot_dimension_numbers<[1], [0], [0], [1], [0, 0, 1, 1], [], []>} : vector<16x8xbf16>, vector<8x32xbf16>, vector<16x32xf32> -> vector<16x32xf32>
    %88 = arith.addf %63, %87 : vector<16x32xf32>
    %89 = vector.extract_strided_slice %39 {offsets = [0, 16], sizes = [16, 8], strides = [1, 1]} : vector<16x96xf32> to vector<16x8xf32>
    %90 = arith.truncf %89 : vector<16x8xf32> to vector<16x8xbf16>
    %91 = vector.extract_strided_slice %39 {offsets = [0, 48], sizes = [16, 8], strides = [1, 1]} : vector<16x96xf32> to vector<16x8xf32>
    %92 = arith.truncf %91 : vector<16x8xf32> to vector<16x8xbf16>
    %93 = vector.extract_strided_slice %39 {offsets = [0, 80], sizes = [16, 8], strides = [1, 1]} : vector<16x96xf32> to vector<16x8xf32>
    %94 = arith.truncf %93 : vector<16x8xf32> to vector<16x8xbf16>
    %cst_39 = arith.constant dense<0.000000e+00> : vector<16x16xf32>
    %95 = tpu.matmul %90, %92, %cst_39 {dimension_numbers = #tpu.dot_dimension_numbers<[1], [1], [0], [0], [0, 0, 1, 0], [], []>} : vector<16x8xbf16>, vector<16x8xbf16>, vector<16x16xf32> -> vector<16x16xf32>
    %96 = arith.addf %95, %5 : vector<16x16xf32>
    %cst_40 = arith.constant dense<0xFF800000> : vector<16xf32>
    %97 = vector.multi_reduction <maximumf>, %96, %cst_40 [1] : vector<16x16xf32> to vector<16xf32>
    %98 = vector.shape_cast %97 : vector<16xf32> to vector<16x1xf32>
    %99 = vector.broadcast %98 : vector<16x1xf32> to vector<16x16xf32>
    %100 = arith.subf %96, %99 : vector<16x16xf32>
    %101 = math.exp %100 : vector<16x16xf32>
    %cst_41 = arith.constant dense<0.000000e+00> : vector<16xf32>
    %102 = vector.multi_reduction <add>, %101, %cst_41 [1] : vector<16x16xf32> to vector<16xf32>
    %103 = vector.shape_cast %102 : vector<16xf32> to vector<16x1xf32>
    %104 = tpu.reciprocal %103 {approx = true} : vector<16x1xf32> -> vector<16x1xf32>
    %105 = vector.broadcast %104 : vector<16x1xf32> to vector<16x16xf32>
    %106 = arith.mulf %101, %105 : vector<16x16xf32>
    %107 = arith.truncf %106 : vector<16x16xf32> to vector<16x16xbf16>
    %cst_42 = arith.constant dense<0.000000e+00> : vector<16x8xf32>
    %108 = tpu.matmul %107, %94, %cst_42 {dimension_numbers = #tpu.dot_dimension_numbers<[1], [0], [0], [1], [0, 0, 1, 1], [], []>} : vector<16x16xbf16>, vector<16x8xbf16>, vector<16x8xf32> -> vector<16x8xf32>
    %109 = arith.truncf %108 : vector<16x8xf32> to vector<16x8xbf16>
    %c0_43 = arith.constant 0 : index
    %c2 = arith.constant 2 : index
    %c0_44 = arith.constant 0 : index
    %c0_45 = arith.constant 0 : index
    %110 = vector.load %arg8[%c0_43, %c2, %c0_44, %c0_45] : memref<1x4x8x32xbf16, #tpu.memory_space<vmem>>, vector<1x1x8x32xbf16>
    %111 = vector.shape_cast %110 : vector<1x1x8x32xbf16> to vector<8x32xbf16>
    %cst_46 = arith.constant dense<0.000000e+00> : vector<16x32xf32>
    %112 = tpu.matmul %109, %111, %cst_46 {dimension_numbers = #tpu.dot_dimension_numbers<[1], [0], [0], [1], [0, 0, 1, 1], [], []>} : vector<16x8xbf16>, vector<8x32xbf16>, vector<16x32xf32> -> vector<16x32xf32>
    %113 = arith.addf %88, %112 : vector<16x32xf32>
    %114 = vector.extract_strided_slice %39 {offsets = [0, 24], sizes = [16, 8], strides = [1, 1]} : vector<16x96xf32> to vector<16x8xf32>
    %115 = arith.truncf %114 : vector<16x8xf32> to vector<16x8xbf16>
    %116 = vector.extract_strided_slice %39 {offsets = [0, 56], sizes = [16, 8], strides = [1, 1]} : vector<16x96xf32> to vector<16x8xf32>
    %117 = arith.truncf %116 : vector<16x8xf32> to vector<16x8xbf16>
    %118 = vector.extract_strided_slice %39 {offsets = [0, 88], sizes = [16, 8], strides = [1, 1]} : vector<16x96xf32> to vector<16x8xf32>
    %119 = arith.truncf %118 : vector<16x8xf32> to vector<16x8xbf16>
    %cst_47 = arith.constant dense<0.000000e+00> : vector<16x16xf32>
    %120 = tpu.matmul %115, %117, %cst_47 {dimension_numbers = #tpu.dot_dimension_numbers<[1], [1], [0], [0], [0, 0, 1, 0], [], []>} : vector<16x8xbf16>, vector<16x8xbf16>, vector<16x16xf32> -> vector<16x16xf32>
    %121 = arith.addf %120, %5 : vector<16x16xf32>
    %cst_48 = arith.constant dense<0xFF800000> : vector<16xf32>
    %122 = vector.multi_reduction <maximumf>, %121, %cst_48 [1] : vector<16x16xf32> to vector<16xf32>
    %123 = vector.shape_cast %122 : vector<16xf32> to vector<16x1xf32>
    %124 = vector.broadcast %123 : vector<16x1xf32> to vector<16x16xf32>
    %125 = arith.subf %121, %124 : vector<16x16xf32>
    %126 = math.exp %125 : vector<16x16xf32>
    %cst_49 = arith.constant dense<0.000000e+00> : vector<16xf32>
    %127 = vector.multi_reduction <add>, %126, %cst_49 [1] : vector<16x16xf32> to vector<16xf32>
    %128 = vector.shape_cast %127 : vector<16xf32> to vector<16x1xf32>
    %129 = tpu.reciprocal %128 {approx = true} : vector<16x1xf32> -> vector<16x1xf32>
    %130 = vector.broadcast %129 : vector<16x1xf32> to vector<16x16xf32>
    %131 = arith.mulf %126, %130 : vector<16x16xf32>
    %132 = arith.truncf %131 : vector<16x16xf32> to vector<16x16xbf16>
    %cst_50 = arith.constant dense<0.000000e+00> : vector<16x8xf32>
    %133 = tpu.matmul %132, %119, %cst_50 {dimension_numbers = #tpu.dot_dimension_numbers<[1], [0], [0], [1], [0, 0, 1, 1], [], []>} : vector<16x16xbf16>, vector<16x8xbf16>, vector<16x8xf32> -> vector<16x8xf32>
    %134 = arith.truncf %133 : vector<16x8xf32> to vector<16x8xbf16>
    %c0_51 = arith.constant 0 : index
    %c3 = arith.constant 3 : index
    %c0_52 = arith.constant 0 : index
    %c0_53 = arith.constant 0 : index
    %135 = vector.load %arg8[%c0_51, %c3, %c0_52, %c0_53] : memref<1x4x8x32xbf16, #tpu.memory_space<vmem>>, vector<1x1x8x32xbf16>
    %136 = vector.shape_cast %135 : vector<1x1x8x32xbf16> to vector<8x32xbf16>
    %cst_54 = arith.constant dense<0.000000e+00> : vector<16x32xf32>
    %137 = tpu.matmul %134, %136, %cst_54 {dimension_numbers = #tpu.dot_dimension_numbers<[1], [0], [0], [1], [0, 0, 1, 1], [], []>} : vector<16x8xbf16>, vector<8x32xbf16>, vector<16x32xf32> -> vector<16x32xf32>
    %138 = arith.addf %113, %137 : vector<16x32xf32>
    %139 = arith.addf %3, %138 : vector<16x32xf32>
    %c0_55 = arith.constant 0 : index
    %c0_56 = arith.constant 0 : index
    %c0_57 = arith.constant 0 : index
    %140 = vector.load %arg9[%c0_55, %c0_56, %c0_57] : memref<1x1x32xf32, #tpu.memory_space<vmem>>, vector<1x1x32xf32>
    %141 = vector.shape_cast %140 : vector<1x1x32xf32> to vector<1x32xf32>
    %142 = vector.broadcast %141 : vector<1x32xf32> to vector<16x32xf32>
    %143 = arith.addf %139, %142 : vector<16x32xf32>
    %c0_58 = arith.constant 0 : index
    %c0_59 = arith.constant 0 : index
    %c0_60 = arith.constant 0 : index
    %144 = vector.load %arg10[%c0_58, %c0_59, %c0_60] : memref<1x1x32xf32, #tpu.memory_space<vmem>>, vector<1x1x32xf32>
    %145 = vector.shape_cast %144 : vector<1x1x32xf32> to vector<1x32xf32>
    %c0_61 = arith.constant 0 : index
    %c0_62 = arith.constant 0 : index
    %c0_63 = arith.constant 0 : index
    %146 = vector.load %arg11[%c0_61, %c0_62, %c0_63] : memref<1x1x32xf32, #tpu.memory_space<vmem>>, vector<1x1x32xf32>
    %147 = vector.shape_cast %146 : vector<1x1x32xf32> to vector<1x32xf32>
    %cst_64 = arith.constant dense<0.000000e+00> : vector<16xf32>
    %148 = vector.multi_reduction <add>, %143, %cst_64 [1] : vector<16x32xf32> to vector<16xf32>
    %149 = vector.shape_cast %148 : vector<16xf32> to vector<16x1xf32>
    %cst_65 = arith.constant 3.200000e+01 : f32
    %150 = vector.broadcast %cst_65 : f32 to vector<16x1xf32>
    %151 = arith.divf %149, %150 : vector<16x1xf32>
    %152 = arith.mulf %143, %143 : vector<16x32xf32>
    %cst_66 = arith.constant dense<0.000000e+00> : vector<16xf32>
    %153 = vector.multi_reduction <add>, %152, %cst_66 [1] : vector<16x32xf32> to vector<16xf32>
    %154 = vector.shape_cast %153 : vector<16xf32> to vector<16x1xf32>
    %cst_67 = arith.constant 3.200000e+01 : f32
    %155 = vector.broadcast %cst_67 : f32 to vector<16x1xf32>
    %156 = arith.divf %154, %155 : vector<16x1xf32>
    %157 = arith.mulf %151, %151 : vector<16x1xf32>
    %158 = arith.subf %156, %157 : vector<16x1xf32>
    %159 = vector.broadcast %151 : vector<16x1xf32> to vector<16x32xf32>
    %160 = arith.subf %143, %159 : vector<16x32xf32>
    %cst_68 = arith.constant 9.99999974E-6 : f32
    %161 = vector.broadcast %cst_68 : f32 to vector<16x1xf32>
    %162 = arith.addf %158, %161 : vector<16x1xf32>
    %163 = math.rsqrt %162 : vector<16x1xf32>
    %164 = vector.broadcast %163 : vector<16x1xf32> to vector<16x32xf32>
    %165 = arith.mulf %160, %164 : vector<16x32xf32>
    %166 = vector.broadcast %145 : vector<1x32xf32> to vector<16x32xf32>
    %167 = arith.mulf %165, %166 : vector<16x32xf32>
    %168 = vector.broadcast %147 : vector<1x32xf32> to vector<16x32xf32>
    %169 = arith.addf %167, %168 : vector<16x32xf32>
    %170 = arith.truncf %169 : vector<16x32xf32> to vector<16x32xbf16>
    %c0_69 = arith.constant 0 : index
    %c0_70 = arith.constant 0 : index
    %c0_71 = arith.constant 0 : index
    %171 = vector.load %arg12[%c0_69, %c0_70, %c0_71] : memref<1x32x128xbf16, #tpu.memory_space<vmem>>, vector<1x32x128xbf16>
    %172 = vector.shape_cast %171 : vector<1x32x128xbf16> to vector<32x128xbf16>
    %cst_72 = arith.constant dense<0.000000e+00> : vector<16x128xf32>
    %173 = tpu.matmul %170, %172, %cst_72 {dimension_numbers = #tpu.dot_dimension_numbers<[1], [0], [0], [1], [0, 0, 1, 1], [], []>} : vector<16x32xbf16>, vector<32x128xbf16>, vector<16x128xf32> -> vector<16x128xf32>
    %c0_73 = arith.constant 0 : index
    %c0_74 = arith.constant 0 : index
    %c0_75 = arith.constant 0 : index
    %174 = vector.load %arg13[%c0_73, %c0_74, %c0_75] : memref<1x1x128xf32, #tpu.memory_space<vmem>>, vector<1x1x128xf32>
    %175 = vector.shape_cast %174 : vector<1x1x128xf32> to vector<1x128xf32>
    %176 = vector.broadcast %175 : vector<1x128xf32> to vector<16x128xf32>
    %177 = arith.addf %173, %176 : vector<16x128xf32>
    %cst_76 = arith.constant 5.000000e-01 : f32
    %178 = vector.broadcast %cst_76 : f32 to vector<16x128xf32>
    %179 = arith.mulf %178, %177 : vector<16x128xf32>
    %cst_77 = arith.constant 4.471500e-02 : f32
    %180 = vector.broadcast %cst_77 : f32 to vector<16x128xf32>
    %181 = arith.mulf %180, %177 : vector<16x128xf32>
    %182 = arith.mulf %181, %177 : vector<16x128xf32>
    %183 = arith.mulf %182, %177 : vector<16x128xf32>
    %184 = arith.addf %177, %183 : vector<16x128xf32>
    %cst_78 = arith.constant 0.797884583 : f32
    %185 = vector.broadcast %cst_78 : f32 to vector<16x128xf32>
    %186 = arith.mulf %185, %184 : vector<16x128xf32>
    %187 = math.tanh %186 : vector<16x128xf32>
    %cst_79 = arith.constant 1.000000e+00 : f32
    %188 = vector.broadcast %cst_79 : f32 to vector<16x128xf32>
    %189 = arith.addf %188, %187 : vector<16x128xf32>
    %190 = arith.mulf %179, %189 : vector<16x128xf32>
    %191 = arith.truncf %190 : vector<16x128xf32> to vector<16x128xbf16>
    %c0_80 = arith.constant 0 : index
    %c0_81 = arith.constant 0 : index
    %c0_82 = arith.constant 0 : index
    %192 = vector.load %arg14[%c0_80, %c0_81, %c0_82] : memref<1x128x32xbf16, #tpu.memory_space<vmem>>, vector<1x128x32xbf16>
    %193 = vector.shape_cast %192 : vector<1x128x32xbf16> to vector<128x32xbf16>
    %cst_83 = arith.constant dense<0.000000e+00> : vector<16x32xf32>
    %194 = tpu.matmul %191, %193, %cst_83 {dimension_numbers = #tpu.dot_dimension_numbers<[1], [0], [0], [1], [0, 0, 1, 1], [], []>} : vector<16x128xbf16>, vector<128x32xbf16>, vector<16x32xf32> -> vector<16x32xf32>
    %195 = arith.addf %143, %194 : vector<16x32xf32>
    %c0_84 = arith.constant 0 : index
    %c0_85 = arith.constant 0 : index
    %c0_86 = arith.constant 0 : index
    %196 = vector.load %arg15[%c0_84, %c0_85, %c0_86] : memref<1x1x32xf32, #tpu.memory_space<vmem>>, vector<1x1x32xf32>
    %197 = vector.shape_cast %196 : vector<1x1x32xf32> to vector<1x32xf32>
    %198 = vector.broadcast %197 : vector<1x32xf32> to vector<16x32xf32>
    %199 = arith.addf %195, %198 : vector<16x32xf32>
    %c0_87 = arith.constant 0 : index
    %c0_88 = arith.constant 0 : index
    %200 = vector.load %arg21[%c0_87, %c0_88] : memref<16x32xf32, #tpu.memory_space<vmem>>, vector<16x32xf32>
    tpu.vector_store %arg21[%c0_87, %c0_88], %199 {strides = array<i32>} : memref<16x32xf32, #tpu.memory_space<vmem>>, vector<16x32xf32>,
    %c1_i32 = arith.constant 1 : i32
    %201 = arith.cmpi eq, %arg1, %c1_i32 : i32
    %202 = arith.extui %201 : i1 to i32
    %c0_i32_89 = arith.constant 0 : i32
    %203 = arith.cmpi ne, %202, %c0_i32_89 : i32
    scf.if %203 {
      %204 = tpu.iota {dimensions = array<i32: 0>} : vector<2x16xi32>
      %205 = tpu.iota {dimensions = array<i32: 1>} : vector<2x16xi32>
      %c8_i32 = arith.constant 8 : i32
      %206 = vector.broadcast %c8_i32 : i32 to vector<2x16xi32>
      %207 = arith.muli %204, %206 : vector<2x16xi32>
      %208 = arith.cmpi eq, %205, %207 : vector<2x16xi32>
      %209 = arith.extui %208 : vector<2x16xi1> to vector<2x16xi32>
      %210 = arith.sitofp %209 : vector<2x16xi32> to vector<2x16xf32>
      %211 = arith.truncf %210 : vector<2x16xf32> to vector<2x16xbf16>
      %212 = arith.truncf %199 : vector<16x32xf32> to vector<16x32xbf16>
      %cst_90 = arith.constant dense<0.000000e+00> : vector<2x32xf32>
      %213 = tpu.matmul %211, %212, %cst_90 {dimension_numbers = #tpu.dot_dimension_numbers<[1], [0], [0], [1], [0, 0, 1, 1], [], []>} : vector<2x16xbf16>, vector<16x32xbf16>, vector<2x32xf32> -> vector<2x32xf32>
      %214 = arith.truncf %213 : vector<2x32xf32> to vector<2x32xbf16>
      %c0_91 = arith.constant 0 : index
      %c0_92 = arith.constant 0 : index
      %215 = vector.load %arg16[%c0_91, %c0_92] : memref<32x32xbf16, #tpu.memory_space<vmem>>, vector<32x32xbf16>
      %cst_93 = arith.constant dense<0.000000e+00> : vector<2x32xf32>
      %216 = tpu.matmul %214, %215, %cst_93 {dimension_numbers = #tpu.dot_dimension_numbers<[1], [0], [0], [1], [0, 0, 1, 1], [], []>} : vector<2x32xbf16>, vector<32x32xbf16>, vector<2x32xf32> -> vector<2x32xf32>
      %c0_94 = arith.constant 0 : index
      %c0_95 = arith.constant 0 : index
      %217 = vector.load %arg17[%c0_94, %c0_95] : memref<1x32xf32, #tpu.memory_space<vmem>>, vector<1x32xf32>
      %218 = vector.broadcast %217 : vector<1x32xf32> to vector<2x32xf32>
      %219 = arith.addf %216, %218 : vector<2x32xf32>
      %cst_96 = arith.constant 0.000000e+00 : f32
      %220 = vector.broadcast %cst_96 : f32 to vector<2x32xf32>
      %221 = arith.maximumf %219, %220 : vector<2x32xf32>
      %222 = arith.truncf %221 : vector<2x32xf32> to vector<2x32xbf16>
      %c0_97 = arith.constant 0 : index
      %c0_98 = arith.constant 0 : index
      %223 = vector.load %arg18[%c0_97, %c0_98] : memref<32x128xbf16, #tpu.memory_space<vmem>>, vector<32x128xbf16>
      %cst_99 = arith.constant dense<0.000000e+00> : vector<2x128xf32>
      %224 = tpu.matmul %222, %223, %cst_99 {dimension_numbers = #tpu.dot_dimension_numbers<[1], [0], [0], [1], [0, 0, 1, 1], [], []>} : vector<2x32xbf16>, vector<32x128xbf16>, vector<2x128xf32> -> vector<2x128xf32>
      %c0_100 = arith.constant 0 : index
      %c0_101 = arith.constant 0 : index
      %225 = vector.load %arg19[%c0_100, %c0_101] : memref<1x128xf32, #tpu.memory_space<vmem>>, vector<1x128xf32>
      %226 = vector.broadcast %225 : vector<1x128xf32> to vector<2x128xf32>
      %227 = arith.addf %224, %226 : vector<2x128xf32>
      %228 = math.absf %227 : vector<2x128xf32>
      %cst_102 = arith.constant 0.000000e+00 : f32
      %229 = vector.broadcast %cst_102 : f32 to vector<2x128xf32>
      %230 = arith.subf %229, %228 : vector<2x128xf32>
      %231 = math.exp %230 : vector<2x128xf32>
      %cst_103 = arith.constant 1.000000e+00 : f32
      %232 = vector.broadcast %cst_103 : f32 to vector<2x128xf32>
      %233 = arith.addf %232, %231 : vector<2x128xf32>
      %234 = tpu.reciprocal %233 {approx = true} : vector<2x128xf32> -> vector<2x128xf32>
      %cst_104 = arith.constant 0.000000e+00 : f32
      %235 = vector.broadcast %cst_104 : f32 to vector<2x128xf32>
      %236 = arith.cmpf oge, %227, %235 : vector<2x128xf32>
      %237 = arith.mulf %231, %234 : vector<2x128xf32>
      %238 = arith.select %236, %234, %237 : vector<2x128xi1>, vector<2x128xf32>
      %c0_105 = arith.constant 0 : index
      %c0_106 = arith.constant 0 : index
      %c0_107 = arith.constant 0 : index
      %239 = vector.load %arg20[%c0_105, %c0_106, %c0_107] : memref<1x2x128xf32, #tpu.memory_space<vmem>>, vector<1x2x128xf32>
      %240 = vector.shape_cast %239 : vector<1x2x128xf32> to vector<2x128xf32>
      %241 = vector.shape_cast %238 : vector<2x128xf32> to vector<1x2x128xf32>
      tpu.vector_store %arg20[%c0_105, %c0_106, %c0_107], %241 {strides = array<i32>} : memref<1x2x128xf32, #tpu.memory_space<vmem>>, vector<1x2x128xf32>,
    } else {
    }
    return
  }
  func.func @transform_0(%arg0: i32, %arg1: i32) -> (i32, i32) {
    %c0_i32 = arith.constant 0 : i32
    %c0_i32_0 = arith.constant 0 : i32
    return %arg0, %c0_i32 : i32, i32
  }
  func.func @transform_1(%arg0: i32, %arg1: i32) -> (i32, i32, i32) {
    %c0_i32 = arith.constant 0 : i32
    %c0_i32_0 = arith.constant 0 : i32
    %c0_i32_1 = arith.constant 0 : i32
    return %arg0, %c0_i32, %c0_i32_0 : i32, i32, i32
  }
  func.func @transform_2(%arg0: i32, %arg1: i32) -> (i32, i32, i32) {
    %c0_i32 = arith.constant 0 : i32
    %c0_i32_0 = arith.constant 0 : i32
    %c0_i32_1 = arith.constant 0 : i32
    return %arg1, %c0_i32, %c0_i32_0 : i32, i32, i32
  }
  func.func @transform_3(%arg0: i32, %arg1: i32) -> (i32, i32, i32) {
    %c0_i32 = arith.constant 0 : i32
    %c0_i32_0 = arith.constant 0 : i32
    %c0_i32_1 = arith.constant 0 : i32
    return %arg1, %c0_i32, %c0_i32_0 : i32, i32, i32
  }
  func.func @transform_4(%arg0: i32, %arg1: i32) -> (i32, i32, i32) {
    %c0_i32 = arith.constant 0 : i32
    %c0_i32_0 = arith.constant 0 : i32
    %c0_i32_1 = arith.constant 0 : i32
    return %arg1, %c0_i32, %c0_i32_0 : i32, i32, i32
  }
  func.func @transform_5(%arg0: i32, %arg1: i32) -> (i32, i32, i32) {
    %c0_i32 = arith.constant 0 : i32
    %c0_i32_0 = arith.constant 0 : i32
    %c0_i32_1 = arith.constant 0 : i32
    return %arg1, %c0_i32, %c0_i32_0 : i32, i32, i32
  }
  func.func @transform_6(%arg0: i32, %arg1: i32) -> (i32, i32, i32, i32) {
    %c0_i32 = arith.constant 0 : i32
    %c0_i32_0 = arith.constant 0 : i32
    %c0_i32_1 = arith.constant 0 : i32
    %c0_i32_2 = arith.constant 0 : i32
    return %arg1, %c0_i32, %c0_i32_0, %c0_i32_1 : i32, i32, i32, i32
  }
  func.func @transform_7(%arg0: i32, %arg1: i32) -> (i32, i32, i32) {
    %c0_i32 = arith.constant 0 : i32
    %c0_i32_0 = arith.constant 0 : i32
    %c0_i32_1 = arith.constant 0 : i32
    return %arg1, %c0_i32, %c0_i32_0 : i32, i32, i32
  }
  func.func @transform_8(%arg0: i32, %arg1: i32) -> (i32, i32, i32) {
    %c0_i32 = arith.constant 0 : i32
    %c0_i32_0 = arith.constant 0 : i32
    %c0_i32_1 = arith.constant 0 : i32
    return %arg1, %c0_i32, %c0_i32_0 : i32, i32, i32
  }
  func.func @transform_9(%arg0: i32, %arg1: i32) -> (i32, i32, i32) {
    %c0_i32 = arith.constant 0 : i32
    %c0_i32_0 = arith.constant 0 : i32
    %c0_i32_1 = arith.constant 0 : i32
    return %arg1, %c0_i32, %c0_i32_0 : i32, i32, i32
  }
  func.func @transform_10(%arg0: i32, %arg1: i32) -> (i32, i32, i32) {
    %c0_i32 = arith.constant 0 : i32
    %c0_i32_0 = arith.constant 0 : i32
    %c0_i32_1 = arith.constant 0 : i32
    return %arg1, %c0_i32, %c0_i32_0 : i32, i32, i32
  }
  func.func @transform_11(%arg0: i32, %arg1: i32) -> (i32, i32, i32) {
    %c0_i32 = arith.constant 0 : i32
    %c0_i32_0 = arith.constant 0 : i32
    %c0_i32_1 = arith.constant 0 : i32
    return %arg1, %c0_i32, %c0_i32_0 : i32, i32, i32
  }
  func.func @transform_12(%arg0: i32, %arg1: i32) -> (i32, i32, i32) {
    %c0_i32 = arith.constant 0 : i32
    %c0_i32_0 = arith.constant 0 : i32
    %c0_i32_1 = arith.constant 0 : i32
    return %arg1, %c0_i32, %c0_i32_0 : i32, i32, i32
  }
  func.func @transform_13(%arg0: i32, %arg1: i32) -> (i32, i32, i32) {
    %c0_i32 = arith.constant 0 : i32
    %c0_i32_0 = arith.constant 0 : i32
    %c0_i32_1 = arith.constant 0 : i32
    return %arg1, %c0_i32, %c0_i32_0 : i32, i32, i32
  }
  func.func @transform_14(%arg0: i32, %arg1: i32) -> (i32, i32) {
    %c0_i32 = arith.constant 0 : i32
    %c0_i32_0 = arith.constant 0 : i32
    %c0_i32_1 = arith.constant 0 : i32
    return %c0_i32, %c0_i32_0 : i32, i32
  }
  func.func @transform_15(%arg0: i32, %arg1: i32) -> (i32, i32) {
    %c0_i32 = arith.constant 0 : i32
    %c0_i32_0 = arith.constant 0 : i32
    %c0_i32_1 = arith.constant 0 : i32
    return %c0_i32, %c0_i32_0 : i32, i32
  }
  func.func @transform_16(%arg0: i32, %arg1: i32) -> (i32, i32) {
    %c0_i32 = arith.constant 0 : i32
    %c0_i32_0 = arith.constant 0 : i32
    %c0_i32_1 = arith.constant 0 : i32
    return %c0_i32, %c0_i32_0 : i32, i32
  }
  func.func @transform_17(%arg0: i32, %arg1: i32) -> (i32, i32) {
    %c0_i32 = arith.constant 0 : i32
    %c0_i32_0 = arith.constant 0 : i32
    %c0_i32_1 = arith.constant 0 : i32
    return %c0_i32, %c0_i32_0 : i32, i32
  }
  func.func @transform_18(%arg0: i32, %arg1: i32) -> (i32, i32, i32) {
    %c0_i32 = arith.constant 0 : i32
    %c0_i32_0 = arith.constant 0 : i32
    %c0_i32_1 = arith.constant 0 : i32
    return %arg0, %c0_i32, %c0_i32_0 : i32, i32, i32
  }
}

</mosaic_0001>

<bundles_post_ra>
// kernel: _forward_jit.1
= control target key start
LH: loop header
LB: loop body
LE: loop exit
PB: predicated region body
PF: predicated region fallthrough
CT: control target
= control target key end

     0   :  { %s3358_s0 = inlined_call_operand.vmem [shape: f32[32,32], index: 0, kind: input, shape index: {}]   ;;  %s3359_s1 = inlined_call_operand.vmem [shape: f32[2,16,16], index: 1, kind: input, shape index: {}]   ;;  %s3360_s2 = inlined_call_operand.vmem [shape: f32[2,1,32], index: 2, kind: input, shape index: {}]   ;;  %s3361_s3 = inlined_call_operand.vmem [shape: f32[2,1,32], index: 3, kind: input, shape index: {}]   ;;  %s3362_s4 = inlined_call_operand.vmem [shape: bf16[2,32,96], index: 4, kind: input, shape index: {}]   ;;  %s3363_s5 = inlined_call_operand.vmem [shape: f32[2,1,96], index: 5, kind: input, shape index: {}]   ;;  %s3364_s6 = inlined_call_operand.vmem [shape: bf16[2,4,8,32], index: 6, kind: input, shape index: {}]   ;;  %s3365_s7 = inlined_call_operand.vmem [shape: f32[2,1,32], index: 7, kind: input, shape index: {}]   ;;  %s3366_s8 = inlined_call_operand.vmem [shape: f32[2,1,32], index: 8, kind: input, shape index: {}]   ;;  %s3367_s9 = inlined_call_operand.vmem [shape: f32[2,1,32], index: 9, kind: input, shape index: {}]   ;;  %s3368_s10 = inlined_call_operand.vmem [shape: bf16[2,32,128], index: 10, kind: input, shape index: {}]   ;;  %s3369_s11 = inlined_call_operand.vmem [shape: f32[2,1,128], index: 11, kind: input, shape index: {}]   ;;  %s3370_s12 = inlined_call_operand.vmem [shape: bf16[2,128,32], index: 12, kind: input, shape index: {}]   ;;  %s3371_s13 = inlined_call_operand.vmem [shape: f32[2,1,32], index: 13, kind: input, shape index: {}]   ;;  %s3372_s14 = inlined_call_operand.vmem [shape: bf16[32,32], index: 14, kind: input, shape index: {}]   ;;  %s3373_s15 = inlined_call_operand.vmem [shape: f32[1,32], index: 15, kind: input, shape index: {}]   ;;  %s3374_s16 = inlined_call_operand.vmem [shape: bf16[32,128], index: 16, kind: input, shape index: {}]   ;;  %s3375_s17 = inlined_call_operand.vmem [shape: f32[1,128], index: 17, kind: input, shape index: {}]   ;;  %s3376_s18 = inlined_call_operand.hbm [shape: f32[2,2,128], index: 18, kind: output, shape index: {}]  }
   0x1   :  { %3395 = sst [smem:[#allocation20_spill]] %s3358_s0 }
   0x2   :  { %3396 = sst [smem:[#allocation21_spill]] %s3359_s1 }
   0x3   :  { %3397 = sst [smem:[#allocation22_spill]] %s3360_s2 }
   0x4   :  { %3398 = sst [smem:[#allocation23_spill]] %s3362_s4 }
   0x5   :  { %3399 = sst [smem:[#allocation24_spill]] %s3364_s6 }
   0x6   :  { %3400 = sst [smem:[#allocation25_spill]] %s3372_s14 }
   0x7   :  { %3401 = sst [smem:[#allocation26_spill]] %s3373_s15 }
   0x8   :  { %3402 = sst [smem:[#allocation27_spill]] %s3374_s16 }
   0x9   :  { %3403 = sst [smem:[#allocation28_spill]] %s3375_s17 }
   0xa   :  { %3404 = sst [smem:[#allocation29_spill]] %s3376_s18 }
   0xb   :  { %23 = vsyncpa [#allocation4], 0 }
   0xc   :  { %25 = vsyncpa [#allocation4 + $0x1], 0  ;;  %s2912_s27 = smov 0   ;;  %s2914_s28 = smov 0  }
   0xd   :  { %s2916_s29 = smov 0   ;;  %s2918_s30 = smov 0  }
   0xe   :  { %s2920_s0 = smov 0   ;;  %s2922_s19 = smov 0  }
   0xf   :  { %s2924_s1 = smov 0   ;;  %s2926_s20 = smov 0  }
  0x10 LB: > { %3405 = sst [smem:[#allocation6_spill]] %s2771_s27  ;;  %s2304_s21 = sadd.s32 4294967295, %s2799_s20   ;;  %s2799_s20 = sphi %s2926_s20, %s31_s20   ;;  %s2795_s1 = sphi %s2924_s1, %s3452_s1   ;;  %s2791_s19 = sphi %s2922_s19, %s3451_s19   ;;  %s2787_s0 = sphi %s2920_s0, %s3450_s0   ;;  %s2783_s30 = sphi %s2918_s30, %s3449_s30   ;;  %s2779_s29 = sphi %s2916_s29, %s3448_s29   ;;  %s2775_s28 = sphi %s2914_s28, %s3447_s28   ;;  %s2771_s27 = sphi %s2912_s27, %s3446_s27  }
  0x11   : > { %3406 = sst [smem:[#allocation7_spill]] %s2775_s28  ;;  %s2305_s22 = sadd.s32 4294967294, %s2799_s20  }
  0x12   : > { %3407 = sst [smem:[#allocation8_spill]] %s2779_s29  ;;  %s40_s2 = sadd.s32 1, %s2791_s19 }
  0x13   : > { %3408 = sst [smem:[#allocation9_spill]] %s2787_s0  ;;  %p41_p0 = scmp.ge.s32.totalorder %s40_s2, 2 }
  0x14   : > { %3409 = sst [smem:[#allocation10_spill]] %s2791_s19  ;;  %s43_s23 = sadd.s32 1, %s2795_s1 }
  0x15   : > { %3410 = sst [smem:[#allocation11_spill]] %s2795_s1  ;;  %p508_p1 = scmp.ne.s32.totalorder %s2779_s29, %s2775_s28 }
  0x16   : > { %3411 = sst [smem:[#allocation12_spill]] %s2799_s20  ;;  %p509_p2 = scmp.eq.s32.totalorder %s2304_s21, 3 }
  0x17   : > { %s3454_s2 = smov (%p41_p0, %s40_s2), 0  ;;  %s3456_s23 = smov (!%p41_p0, %s43_s23), %s2795_s1 }
  0x18   : > { %3412 = sst [smem:[#allocation13_spill]] %s3454_s2  ;;  %p2961_p3 = por %p509_p2, %p508_p1 }
  0x19   : > { %p514_p4 = scmp.ne.s32.totalorder %s2775_s28, %s2771_s27  ;;  %p45_p5 = scmp.ge.s32.totalorder %s3456_s23, 2 }
  0x1a   : > { %s3413_s24 = scalar_select %p2961_p3, 1, 0 }
  0x1b   : > { %p515_p6 = scmp.eq.s32.totalorder %s2305_s22, 3  ;;  %p2308_p7 = scmp.ge.s32.totalorder %s2799_s20, 1 }
  0x1c   : > { %3414 = sst [smem:[#allocation14_spill]] %s3413_s24  ;;  %p642_p8 = scmp.lt.s32.totalorder %s2799_s20, 5 }
  0x1d   : > { %s3458_s23 = smov (%p45_p5, %s3456_s23), 0  ;;  %p2971_p9 = por %p515_p6, %p514_p4 }
  0x1e   : > { %3415 = sst [smem:[#allocation15_spill]] %s3458_s23  ;;  %p643_p10 = pnand %p2308_p7, %p642_p8 }
  0x1f   : > { %s3416_s25 = scalar_select %p2971_p9, 1, 0 }
  0x20   : > { %s495_s26 = ssub.s32 %s2795_s1, %s3458_s23  ;;  %s498_s21 = sadd.s32 1, %s2779_s29 }
  0x21   : > { %3417 = sst [smem:[#allocation16_spill]] %s3416_s25  ;;  %p496_p11 = scmp.eq.s32.totalorder %s495_s26, 0 }
  0x22   : > { %646 = sbr.rel (%p643_p10) target bundleno = 4514 (0x11a2), region = 92 }
  0x23   : > { %s2979_s2 = scalar_select %p496_p11, %s2779_s29, %s498_s21  }
  0x25   : > { %3418 = sst [smem:[#allocation17_spill]] %s2979_s2 }
  0x27   : > { %s3389_s22 = sand.u32 1, %s2775_s28   ;;  %s2310_s19 = sshll.u32 %s2787_s0, 1 }
  0x28   : > { %s2985_s27 = sshll.u32 %s3389_s22, 1  ;;  %p746_p12 = scmp.lt.s32.totalorder %s2310_s19, 3 }
  0x29   : > { %p751_p13 = scmp.lt.s32.totalorder %s2787_s0, 1  ;;  %p756_p0 = scmp.lt.s32.totalorder %s2783_s30, 1 }
  0x2a   : > { %s3460_s19 = smov (!%p746_p12, %s2310_s19), 3  ;;  %s3419_s2 = sld [smem:[#allocation20_spill]] }
  0x2b   : > { %s752_s23 = scalar_select %p751_p13, %s2787_s0, 1 }
  0x2c   : > { %s2311_s26 = sshll.u32 %s3460_s19, 3  ;;  %s3420_s24 = sld [smem:[#allocation21_spill]] }
  0x2d   : > { %s2375_s25 = sshll.u32 %s752_s23, 4  ;;  %s3423_s4 = sld [smem:[#allocation23_spill]] }
  0x2e   : > { %s2999_s28 = scalar_select %p756_p0, %s2783_s30, 1 }
  0x2f   : > { %s3424_s6 = sld [smem:[#allocation24_spill]]  ;;  %p2322_p1 = scmp.ne.s32.totalorder %s2783_s30, 0 }
  0x30   : > { %s749_s29 = scalar_lea.vmem %s3419_s2, %s2311_s26  ;;  %s2376_s2 = sshll.u32 %s2999_s28, 4 }
  0x31   : > { %s799_s23 = scalar_lea.vmem %s3371_s13, %s2999_s28 }
  0x32   : > { %s2996_s17 = scalar_lea.vmem %s3420_s24, %s2375_s25  ;;  %s783_s25 = scalar_lea.vmem %s3367_s9, %s2999_s28 }
  0x33   : > { %3421 = sst [smem:[#allocation18_spill]] %s2996_s17  ;;  %s3017_s26 = scalar_lea.vmem %s3423_s4, %s2376_s2 }
  0x34   : > { %s780_s17 = scalar_lea.vmem %s3366_s8, %s2999_s28  ;;  %s3039_s4 = scalar_lea.vmem %s3368_s10, %s2376_s2 }
  0x35   : > { %s3022_s14 = scalar_lea.vmem %s3424_s6, %s2376_s2  ;;  %s791_s6 = scalar_lea.vmem %s3369_s11, %s2999_s28 }
  0x36   : > { %3425 = sst [smem:[#allocation19_spill]] %s3022_s14  ;;  %s2379_s14 = sshll.u32 %s2999_s28, 6 }
  0x37   : > { %s3049_s18 = scalar_lea.vmem %s3370_s12, %s2379_s14  ;;  %s744_s24 = scalar_lea.vmem [#allocation3], %s2985_s27 }
  0x38   : > { %804 = sbr.rel (%p2322_p1) target bundleno = 63 (0x3f), region = 96 }
  0x3d   : > { %v805_v0 = vld [vmem:[%s749_s29] sm:$0xff]  ;;  %vm807_vm0 = vcmask 261120   ;;  %v806_v1 = vld [vmem:[%s749_s29 + $0x8] sm:$0xff] }
  0x3e   : > { %808 = vst.msk [vmem:[#allocation2] sm:$0xff] %vm807_vm0, %v805_v0  ;;  %809 = vst.msk [vmem:[#allocation2 + $0x8] sm:$0xff] %vm807_vm0, %v806_v1 }
  0x3f PF: > { %vm816_vm1 = vcmask 261120   ;;  %v2643_v10 = vld [vmem:[%s3017_s26 + $0x8] sm:$0xff]   ;;  %v2801_v11 = vmov 0.0   ;;  %vm2802_vm2 = vmmov 0   ;;  %v2644_v12 = vld [vmem:[%s3017_s26] sm:$0xff]   ;;  %s3426_s2 = sld [smem:[#allocation22_spill]]  ;;  %s3428_s0 = scalar_lea.vmem %s3361_s3, %s2999_s28 }
  0x40   : > { %2427 = vmatprep.subr.bf16.mxu1 %v2801_v11  ;;  %2431 = vmatprep.mubr.msk.bf16.mxu1 %vm2802_vm2, %v2801_v11  ;;  %v2324_v35 = vld [vmem:[%s3428_s0] ss:$0 sm:$0xff]  ;;  %s3429_s16 = scalar_lea.vmem %s3363_s5, %s2999_s28  ;;  %s3430_s20 = sld [smem:[#allocation18_spill]]  ;;  %vm936_vm3 = vcmask 64512   ;;  %vm984_vm4 = vcmask 130048   ;;  %vm1184_vm5 = vcmask 1043456  }
  0x41   : > { %2428 = vmatpush3.bf16.msra.mxu1 %v2643_v10  ;;  %2453 = vmatprep.subr.bf16.mxu0 %v2801_v11  ;;  %v2325_v41 = vld [vmem:[%s3429_s16] ss:$0 sm:$0xff]  ;;  %s2803_s1 = smov 96   ;;  %s2804_s14 = smov 88  }
  0x42   : > { %2429 = vmatprep.subr.bf16.mxu1 %v2801_v11  ;;  %2455 = vmatprep.mubr.msk.bf16.mxu0 %vm2802_vm2, %v2801_v11  ;;  %s2805_s29 = smov 120   ;;  %s2808_s15 = smov 112  }
  0x43   : > { %s3431_s22 = sld [smem:[#allocation19_spill]]  ;;  %s2809_s0 = smov 56  }
  0x44   : > { %s2810_s21 = smov 48   ;;  %s2811_s19 = smov 104  }
  0x45   : > { %v3057_v2 = vld [vmem:[#allocation2] sm:$0xff]  ;;  %v3059_v3 = vld [vmem:[#allocation2 + $0x8] sm:$0xff]  ;;  %2430 = vmatpush3.bf16.msra.mxu1 %v2644_v12  ;;  %s3427_s26 = scalar_lea.vmem %s3426_s2, %s2999_s28  ;;  %s2806_s2 = smov 64  }
  0x46   : > { %v817_v4 = vsel %vm816_vm1, %v3057_v2, 0.0  ;;  %v826_v5 = vmul.f32 %v3057_v2, %v3057_v2  ;;  %v820_v6 = vsel %vm816_vm1, %v3059_v3, 0.0  ;;  %v827_v7 = vmul.f32 %v3059_v3, %v3059_v3  ;;  %2435 = vmatprep.subr.bf16.mxu1 %v2801_v11  ;;  %v2323_v30 = vld [vmem:[%s3427_s26] ss:$0 sm:$0xff]  ;;  %v3117_v54 = vld [vmem:[%s3430_s20 + $0x8] sm:$0xff]  ;;  %s2807_s26 = smov 80  }
  0x47   : > { %818 = vadd.xlane.f32.xlu0 %v817_v4  ;;  %v3113_v50 = vld [vmem:[%s3430_s20] sm:$0xff]  ;;  %s2812_s16 = smov 72   ;;  %s2813_s20 = smov 40  }
  0x48   : > { %v828_v8 = vsel %vm816_vm1, %v826_v5, 0.0  ;;  %v831_v9 = vsel %vm816_vm1, %v827_v7, 0.0  ;;  %p2360_p2 = scmp.ne.s32.totalorder %s2783_s30, 1 }
  0x49   : > { %829 = vadd.xlane.f32.xlu1 %v828_v8 }
  0x4b   : > { %821 = vadd.xlane.f32.xlu0 %v820_v6 }
  0x4d   : > { %832 = vadd.xlane.f32.xlu1 %v831_v9 }
  0xd0   : > { %v819_v13 = vpop.xlane.xlu0 %818 }
  0xd1   : > { %v824_v14 = vmul.f32 0.03125, %v819_v13 }
  0xd2   : > { %v830_v15 = vpop.xlane.xlu1 %829 }
  0xd3   : > { %v836_v16 = vmul.f32 %v824_v14, %v824_v14  ;;  %v834_v17 = vmul.f32 0.03125, %v830_v15  ;;  %v840_v27 = vsub.f32 %v3057_v2, %v824_v14 }
  0xd4   : > { %v822_v18 = vpop.xlane.xlu0 %821 }
  0xd5   : > { %v838_v19 = vsub.f32 %v834_v17, %v836_v16  ;;  %v825_v20 = vmul.f32 0.03125, %v822_v18 }
  0xd6   : > { %v833_v21 = vpop.xlane.xlu1 %832 }
  0xd7   : > { %v842_v22 = vadd.f32 1e-05, %v838_v19  ;;  %v837_v23 = vmul.f32 %v825_v20, %v825_v20  ;;  %v835_v24 = vmul.f32 0.03125, %v833_v21  ;;  %v841_v31 = vsub.f32 %v3059_v3, %v825_v20 }
  0xd9   : > { %2655 = vrsqrt.f32 %v842_v22  ;;  %v839_v25 = vsub.f32 %v835_v24, %v837_v23 }
  0xdb   : > { %v843_v26 = vadd.f32 1e-05, %v839_v25 }
  0xdd   : > { %2657 = vrsqrt.f32 %v843_v26 }
  0xe6   : > { %v2656_v28 = vpop.eup %2655 }
  0xe7   : > { %v846_v29 = vmul.f32 %v2656_v28, %v840_v27 }
  0xe9   : > { %v854_v34 = vmul.f32 %v2323_v30, %v846_v29 }
  0xea   : > { %v2658_v32 = vpop.eup %2657 }
  0xeb   : > { %v847_v33 = vmul.f32 %v2658_v32, %v841_v31  ;;  %v862_v37 = vadd.f32 %v2324_v35, %v854_v34 }
  0xed   : > { %v855_v36 = vmul.f32 %v2323_v30, %v847_v33 }
  0xef   : > { %v863_v38 = vadd.f32 %v2324_v35, %v855_v36 }
  0xf1   : > { %v864_v39 = vpack.c.bf16 %v863_v38, %v862_v37 }
  0xf3   : > { %2432 = vmatmul.mubr.msk.bf16.vlgmr.msra.gmra.mxu1 %vm816_vm1, %v864_v39 }
  0xf4   : > { %2437 = vmatprep.mubr.msk.bf16.mxu1 %vm2802_vm2, %v2801_v11 }
 0x1b3   : > { %v925_v40 = vpop.f32.mrf.mxu1 }
 0x1b4   : > { %v926_v44 = vadd.f32 %v2325_v41, %v925_v40 }
 0x1b5   : > { %v2433_v42 = vpop.f32.mrf.mxu1 }
 0x1b7   : > { %v928_v43 = vpop.f32.mrf.mxu1 }
 0x1b8   : > { %v929_v45 = vadd.f32 %v2325_v41, %v928_v43 }
 0x1b9   : > { %v2434_v46 = vpop.f32.mrf.mxu1 }
 0x1ba   : > { %v3101_v47 = vpack.c.bf16 %v929_v45, %v926_v44 }
 0x1bc   : > { %934 = vrot.lane.b32.xlu0 %v3101_v47, %s2803_s1 }
 0x1c0   : > { %1059 = vrot.lane.b32.xlu0 %v3101_v47, %s2804_s14 }
 0x1c4   : > { %1057 = vrot.lane.b32.xlu0 %v3101_v47, %s2805_s29  ;;  %s3432_s29 = scalar_lea.vmem %s3365_s7, %s2999_s28 }
 0x22e   : > { %v935_v48 = vpop.permute.xlu0 %934 }
 0x22f   : > { %v941_v49 = vsel %vm936_vm3, %v935_v48, 0 }
 0x230   : > { %2436 = vmatpush3.bf16.xpose.msra.mxu1 %v941_v49  ;;  %v1056_v49 = vld [vmem:[%s3431_s22] sm:$0xf] }
 0x231   : > { %2441 = vmatprep.subr.bf16.mxu1 %v2801_v11 }
 0x232   : > { %v1060_v16 = vpop.permute.xlu0 %1059 }
 0x233   : > { %v1065_v18 = vsel %vm936_vm3, %v1060_v16, 0 }
 0x236   : > { %v1058_v19 = vpop.permute.xlu0 %1057 }
 0x237   : > { %2438 = vmatmul.mubr.msk.bf16.vlgmr.msra.gmra.mxu1 %vm936_vm3, %v3101_v47 }
 0x238   : > { %2443 = vmatprep.mubr.msk.bf16.mxu1 %vm2802_vm2, %v2801_v11 }
 0x2f7   : > { %v977_v51 = vpop.f32.mrf.mxu1 }
 0x2f8   : > { %v978_v52 = vadd.f32 %v977_v51, %v3113_v50 }
 0x2f9   : > { %v2439_v53 = vpop.f32.mrf.mxu1 }
 0x2fa   : > { %v985_v55 = vsel %vm984_vm4, %v978_v52, -inf }
 0x2fb   : > { %986 = vmax.xlane.f32.xlu1 %v985_v55  ;;  %v980_v56 = vpop.f32.mrf.mxu1  ;;  %v1233_v55 = vsel %vm1184_vm5, %v1056_v49, 0 }
 0x2fc   : > { %v981_v57 = vadd.f32 %v980_v56, %v3117_v54  ;;  %v2333_v56 = vld [vmem:[%s3431_s22 + $0x4] sm:$0xf] }
 0x2fd   : > { %v2440_v58 = vpop.f32.mrf.mxu1 }
 0x2fe   : > { %v988_v59 = vsel %vm984_vm4, %v981_v57, -inf }
 0x2ff   : > { %989 = vmax.xlane.f32.xlu1 %v988_v59 }
 0x384   : > { %v987_v60 = vpop.xlane.xlu1 %986 }
 0x385   : > { %v991_v61 = vsub.f32 %v978_v52, %v987_v60 }
 0x387   : > { %v993_v62 = vmul.f32 1.442695, %v991_v61 }
 0x388   : > { %v990_v63 = vpop.xlane.xlu1 %989 }
 0x389   : > { %2659 = vpow2.f32 %v993_v62  ;;  %v992_v0 = vsub.f32 %v981_v57, %v990_v63  ;;  %v1186_v57 = vsel %vm1184_vm5, %v2333_v56, 0 }
 0x38b   : > { %v995_v1 = vmul.f32 1.442695, %v992_v0 }
 0x38d   : > { %2661 = vpow2.f32 %v995_v1 }
 0x396   : > { %v2660_v4 = vpop.eup %2659 }
 0x397   : > { %v997_v5 = vsel %vm984_vm4, %v2660_v4, 0.0 }
 0x398   : > { %998 = vadd.xlane.f32.xlu1 %v997_v5 }
 0x39a   : > { %v2662_v6 = vpop.eup %2661 }
 0x39b   : > { %v1000_v7 = vsel %vm984_vm4, %v2662_v6, 0.0 }
 0x39c   : > { %1001 = vadd.xlane.f32.xlu1 %v1000_v7 }
 0x3ad   : > { %1008 = vrot.lane.b32.xlu1 %v3101_v47, %s2806_s2 }
 0x421   : > { %v999_v8 = vpop.xlane.xlu1 %998 }
 0x422   : > { %2663 = vrcp.f32 %v999_v8 }
 0x425   : > { %v1002_v9 = vpop.xlane.xlu1 %1001 }
 0x426   : > { %2665 = vrcp.f32 %v1002_v9 }
 0x429   : > { %v1009_v10 = vpop.permute.xlu1 %1008 }
 0x42a   : > { %2442 = vmatpush3.bf16.msra.mxu1 %v1009_v10 }
 0x42b   : > { %2447 = vmatprep.subr.bf16.mxu1 %v2801_v11 }
 0x42f   : > { %v2664_v12 = vpop.eup %2663 }
 0x430   : > { %v1005_v14 = vmul.f32 %v2664_v12, %v2660_v4 }
 0x433   : > { %v2666_v13 = vpop.eup %2665 }
 0x434   : > { %v1006_v15 = vmul.f32 %v2666_v13, %v2662_v6 }
 0x436   : > { %v1007_v17 = vpack.c.bf16 %v1006_v15, %v1005_v14 }
 0x438   : > { %2444 = vmatmul.mubr.msk.bf16.vlgmr.msra.gmra.mxu1 %vm984_vm4, %v1007_v17 }
 0x439   : > { %2448 = vmatpush3.bf16.xpose.msra.mxu1 %v1065_v18  ;;  %2449 = vmatprep.mubr.msk.bf16.mxu1 %vm2802_vm2, %v2801_v11 }
 0x43a   : > { %2459 = vmatprep.subr.bf16.mxu1 %v2801_v11 }
 0x440   : > { %2450 = vmatmul.mubr.msk.bf16.vlgmr.msra.gmra.mxu1 %vm936_vm3, %v1058_v19 }
 0x441   : > { %2461 = vmatprep.mubr.msk.bf16.mxu1 %vm2802_vm2, %v2801_v11  ;;  %2460 = vmatpush3.bf16.msra.mxu1 %v1186_v57 }
 0x442   : > { %2471 = vmatprep.subr.bf16.mxu1 %v2801_v11 }
 0x4f8   : > { %v1048_v20 = vpop.f32.mrf.mxu1 }
 0x4fa   : > { %v2445_v21 = vpop.f32.mrf.mxu1 }
 0x4fc   : > { %v1051_v22 = vpop.f32.mrf.mxu1 }
 0x4fd   : > { %v1055_v23 = vpack.c.bf16 %v1051_v22, %v1048_v20 }
 0x4fe   : > { %v2446_v24 = vpop.f32.mrf.mxu1 }
 0x500   : > { %v1101_v25 = vpop.f32.mrf.mxu1 }
 0x501   : > { %v1102_v26 = vadd.f32 %v1101_v25, %v3113_v50 }
 0x502   : > { %v2451_v27 = vpop.f32.mrf.mxu1 }
 0x503   : > { %v1108_v28 = vsel %vm984_vm4, %v1102_v26, -inf }
 0x504   : > { %1109 = vmax.xlane.f32.xlu0 %v1108_v28  ;;  %v1104_v29 = vpop.f32.mrf.mxu1 }
 0x505   : > { %v1105_v30 = vadd.f32 %v1104_v29, %v3117_v54 }
 0x506   : > { %v2452_v31 = vpop.f32.mrf.mxu1 }
 0x507   : > { %v1111_v32 = vsel %vm984_vm4, %v1105_v30, -inf }
 0x508   : > { %1112 = vmax.xlane.f32.xlu1 %v1111_v32 }
 0x519   : > { %1278 = vrot.lane.b32.xlu1 %v3101_v47, %s2807_s26 }
 0x51d   : > { %1276 = vrot.lane.b32.xlu1 %v3101_v47, %s2808_s15  ;;  %s3436_s15 = sld [smem:[#allocation28_spill]] (!%p2360_p2) }
 0x58d   : > { %v1110_v33 = vpop.xlane.xlu0 %1109 }
 0x58e   : > { %v1114_v34 = vsub.f32 %v1102_v26, %v1110_v33 }
 0x590   : > { %v1116_v35 = vmul.f32 1.442695, %v1114_v34 }
 0x591   : > { %v1113_v36 = vpop.xlane.xlu1 %1112 }
 0x592   : > { %2667 = vpow2.f32 %v1116_v35  ;;  %v1115_v37 = vsub.f32 %v1105_v30, %v1113_v36 }
 0x594   : > { %v1118_v38 = vmul.f32 1.442695, %v1115_v37 }
 0x595   : > { %v1279_v60 = vpop.permute.xlu1 %1278 }
 0x596   : > { %2669 = vpow2.f32 %v1118_v38  ;;  %v1284_v0 = vsel %vm936_vm3, %v1279_v60, 0 }
 0x599   : > { %v1277_v6 = vpop.permute.xlu1 %1276 }
 0x59f   : > { %v2668_v39 = vpop.eup %2667 }
 0x5a0   : > { %v1120_v40 = vsel %vm984_vm4, %v2668_v39, 0.0 }
 0x5a1   : > { %1121 = vadd.xlane.f32.xlu0 %v1120_v40 }
 0x5a3   : > { %v2670_v41 = vpop.eup %2669 }
 0x5a4   : > { %v1123_v42 = vsel %vm984_vm4, %v2670_v41, 0.0 }
 0x5a5   : > { %1124 = vadd.xlane.f32.xlu0 %v1123_v42  ;;  %v2338_v42 = vld [vmem:[%s3431_s22 + $0x8] sm:$0xf] }
 0x5bb   : > { %1131 = vrot.lane.b32.xlu0 %v3101_v47, %s2809_s0 }
 0x62a   : > { %v1122_v43 = vpop.xlane.xlu0 %1121 }
 0x62b   : > { %2671 = vrcp.f32 %v1122_v43  ;;  %v1404_v43 = vsel %vm1184_vm5, %v2338_v42, 0 }
 0x62e   : > { %v1125_v44 = vpop.xlane.xlu0 %1124 }
 0x62f   : > { %2673 = vrcp.f32 %v1125_v44 }
 0x632   : > { %v1132_v45 = vpop.permute.xlu0 %1131 }
 0x633   : > { %2454 = vmatpush3.bf16.msra.mxu0 %v1132_v45 }
 0x634   : > { %2465 = vmatprep.subr.bf16.mxu0 %v2801_v11 }
 0x638   : > { %v2672_v46 = vpop.eup %2671 }
 0x639   : > { %v1128_v51 = vmul.f32 %v2672_v46, %v2668_v39 }
 0x63c   : > { %v2674_v48 = vpop.eup %2673 }
 0x63d   : > { %v1129_v52 = vmul.f32 %v2674_v48, %v2670_v41 }
 0x63f   : > { %v1130_v53 = vpack.c.bf16 %v1129_v52, %v1128_v51 }
 0x641   : > { %2456 = vmatmul.mubr.msk.bf16.vlgmr.msra.gmra.mxu0 %vm984_vm4, %v1130_v53 }
 0x642   : > { %2466 = vmatpush3.bf16.msra.mxu0 %v1233_v55  ;;  %2467 = vmatprep.mubr.msk.bf16.mxu0 %vm2802_vm2, %v2801_v11 }
 0x643   : > { %2477 = vmatprep.subr.bf16.mxu0 %v2801_v11 }
 0x649   : > { %2468 = vmatmul.mubr.msk.bf16.vlgmr.msra.gmra.mxu0 %vm936_vm3, %v1055_v23 }
 0x64a   : > { %2479 = vmatprep.mubr.msk.bf16.mxu0 %vm2802_vm2, %v2801_v11 }
 0x701   : > { %v1171_v58 = vpop.f32.mrf.mxu0 }
 0x703   : > { %v2457_v59 = vpop.f32.mrf.mxu0 }
 0x705   : > { %v1174_v61 = vpop.f32.mrf.mxu0 }
 0x706   : > { %v1178_v62 = vpack.c.bf16 %v1174_v61, %v1171_v58 }
 0x707   : > { %v2458_v63 = vpop.f32.mrf.mxu0 }
 0x708   : > { %2462 = vmatmul.mubr.msk.bf16.vlgmr.msra.gmra.mxu1 %vm936_vm3, %v1178_v62 }
 0x709   : > { %2472 = vmatpush3.bf16.xpose.msra.mxu1 %v1284_v0  ;;  %v3158_v1 = vpop.f32.mrf.mxu0  ;;  %2473 = vmatprep.mubr.msk.bf16.mxu1 %vm2802_vm2, %v2801_v11 }
 0x70a   : > { %2483 = vmatprep.subr.bf16.mxu1 %v2801_v11 }
 0x70b   : > { %v2469_v4 = vpop.f32.mrf.mxu0 }
 0x70d   : > { %v3163_v5 = vpop.f32.mrf.mxu0 }
 0x70f   : > { %v2470_v7 = vpop.f32.mrf.mxu0 }
 0x710   : > { %2474 = vmatmul.mubr.msk.bf16.vlgmr.msra.gmra.mxu1 %vm936_vm3, %v1277_v6 }
 0x711   : > { %2485 = vmatprep.mubr.msk.bf16.mxu1 %vm2802_vm2, %v2801_v11  ;;  %2484 = vmatpush3.bf16.msra.mxu1 %v1404_v43 }
 0x712   : > { %2495 = vmatprep.subr.bf16.mxu1 %v2801_v11 }
 0x7c8   : > { %v3168_v8 = vpop.f32.mrf.mxu1 }
 0x7ca   : > { %v2463_v9 = vpop.f32.mrf.mxu1 }
 0x7cc   : > { %v3170_v10 = vpop.f32.mrf.mxu1 }
 0x7ce   : > { %v2464_v12 = vpop.f32.mrf.mxu1 }
 0x7d0   : > { %v1320_v13 = vpop.f32.mrf.mxu1 }
 0x7d1   : > { %v1321_v14 = vadd.f32 %v1320_v13, %v3113_v50 }
 0x7d2   : > { %v2475_v15 = vpop.f32.mrf.mxu1 }
 0x7d3   : > { %v1327_v16 = vsel %vm984_vm4, %v1321_v14, -inf  ;;  %v1273_v15 = vadd.f32 %v3163_v5, %v3170_v10  ;;  %v2342_v5 = vld [vmem:[%s3431_s22 + $0xc] sm:$0xf]  ;;  %s3433_s22 = sld [smem:[#allocation25_spill]] (!%p2360_p2) }
 0x7d4   : > { %1328 = vmax.xlane.f32.xlu1 %v1327_v16  ;;  %v1323_v17 = vpop.f32.mrf.mxu1  ;;  %v1577_v10 = vsel %vm1184_vm5, %v2342_v5, 0 }
 0x7d5   : > { %v1324_v18 = vadd.f32 %v1323_v17, %v3117_v54 }
 0x7d6   : > { %v2476_v19 = vpop.f32.mrf.mxu1 }
 0x7d7   : > { %v1330_v20 = vsel %vm984_vm4, %v1324_v18, -inf }
 0x7d8   : > { %1331 = vmax.xlane.f32.xlu0 %v1330_v20 }
 0x7e5   : > { %1350 = vrot.lane.b32.xlu1 %v3101_v47, %s2810_s21 }
 0x7e9   : > { %1449 = vrot.lane.b32.xlu1 %v3101_v47, %s2811_s19 }
 0x85d   : > { %v1329_v21 = vpop.xlane.xlu1 %1328 }
 0x85e   : > { %v1333_v22 = vsub.f32 %v1321_v14, %v1329_v21 }
 0x860   : > { %v1335_v23 = vmul.f32 1.442695, %v1333_v22 }
 0x861   : > { %v1351_v24 = vpop.permute.xlu1 %1350  ;;  %v1332_v25 = vpop.xlane.xlu0 %1331 }
 0x862   : > { %2675 = vpow2.f32 %v1335_v23  ;;  %v1334_v26 = vsub.f32 %v1324_v18, %v1332_v25  ;;  %2478 = vmatpush3.bf16.msra.mxu0 %v1351_v24 }
 0x863   : > { %2489 = vmatprep.subr.bf16.mxu0 %v2801_v11 }
 0x864   : > { %v1337_v27 = vmul.f32 1.442695, %v1334_v26 }
 0x865   : > { %v1450_v41 = vpop.permute.xlu1 %1449 }
 0x866   : > { %2677 = vpow2.f32 %v1337_v27 }
 0x86f   : > { %v2676_v28 = vpop.eup %2675 }
 0x870   : > { %v1339_v29 = vsel %vm984_vm4, %v2676_v28, 0.0 }
 0x871   : > { %1340 = vadd.xlane.f32.xlu0 %v1339_v29 }
 0x873   : > { %v2678_v30 = vpop.eup %2677 }
 0x874   : > { %v1342_v31 = vsel %vm984_vm4, %v2678_v30, 0.0 }
 0x875   : > { %1343 = vadd.xlane.f32.xlu0 %v1342_v31  ;;  %v2344_v31 = vld [vmem:[%s3432_s29] ss:$0 sm:$0xff] }
 0x88b   : > { %1451 = vrot.lane.b32.xlu0 %v3101_v47, %s2812_s16  ;;  %s3434_s16 = sld [smem:[#allocation27_spill]] (!%p2360_p2) }
 0x8fa   : > { %v1341_v32 = vpop.xlane.xlu0 %1340 }
 0x8fb   : > { %2679 = vrcp.f32 %v1341_v32 }
 0x8fe   : > { %v1344_v33 = vpop.xlane.xlu0 %1343 }
 0x8ff   : > { %2681 = vrcp.f32 %v1344_v33 }
 0x902   : > { %v1452_v38 = vpop.permute.xlu0 %1451 }
 0x903   : > { %v1457_v40 = vsel %vm936_vm3, %v1452_v38, 0 }
 0x908   : > { %v2680_v34 = vpop.eup %2679 }
 0x909   : > { %v1347_v36 = vmul.f32 %v2680_v34, %v2676_v28 }
 0x90c   : > { %v2682_v35 = vpop.eup %2681 }
 0x90d   : > { %v1348_v37 = vmul.f32 %v2682_v35, %v2678_v30 }
 0x90f   : > { %v1349_v39 = vpack.c.bf16 %v1348_v37, %v1347_v36 }
 0x911   : > { %2480 = vmatmul.mubr.msk.bf16.vlgmr.msra.gmra.mxu0 %vm984_vm4, %v1349_v39 }
 0x912   : > { %2490 = vmatpush3.bf16.xpose.msra.mxu0 %v1457_v40  ;;  %2491 = vmatprep.mubr.msk.bf16.mxu0 %vm2802_vm2, %v2801_v11 }
 0x913   : > { %2501 = vmatprep.subr.bf16.mxu0 %v2801_v11 }
 0x919   : > { %2492 = vmatmul.mubr.msk.bf16.vlgmr.msra.gmra.mxu0 %vm936_vm3, %v1450_v41 }
 0x91a   : > { %2503 = vmatprep.mubr.msk.bf16.mxu0 %vm2802_vm2, %v2801_v11  ;;  %2502 = vmatpush3.bf16.msra.mxu0 %v1577_v10 }
 0x91b   : > { %2515 = vmatprep.subr.bf16.mxu0 %v2801_v11 }
 0x9d1   : > { %v1390_v44 = vpop.f32.mrf.mxu0 }
 0x9d3   : > { %v2481_v45 = vpop.f32.mrf.mxu0 }
 0x9d4   : > { %v2646_v45 = vld [vmem:[%s3039_s4] sm:$0xff]  }
 0x9d5   : > { %v1393_v46 = vpop.f32.mrf.mxu0 }
 0x9d6   : > { %v1397_v48 = vpack.c.bf16 %v1393_v46, %v1390_v44  ;;  %v2645_v44 = vld [vmem:[%s3039_s4 + $0x8] sm:$0xff]   ;;  %s3435_s4 = sld [smem:[#allocation26_spill]] (!%p2360_p2) }
 0x9d7   : > { %v2482_v49 = vpop.f32.mrf.mxu0 }
 0x9d8   : > { %2486 = vmatmul.mubr.msk.bf16.vlgmr.msra.gmra.mxu1 %vm936_vm3, %v1397_v48 }
 0x9d9   : > { %v1493_v51 = vpop.f32.mrf.mxu0  ;;  %2497 = vmatprep.mubr.msk.bf16.mxu1 %vm2802_vm2, %v2801_v11 }
 0x9da   : > { %v1494_v52 = vadd.f32 %v1493_v51, %v3113_v50 }
 0x9db   : > { %v2493_v53 = vpop.f32.mrf.mxu0 }
 0x9dc   : > { %v1500_v55 = vsel %vm984_vm4, %v1494_v52, -inf }
 0x9dd   : > { %1501 = vmax.xlane.f32.xlu1 %v1500_v55  ;;  %v1496_v56 = vpop.f32.mrf.mxu0 }
 0x9de   : > { %v1497_v57 = vadd.f32 %v1496_v56, %v3117_v54  ;;  %v1270_v54 = vadd.f32 %v3158_v1, %v3168_v8 }
 0x9df   : > { %v2494_v58 = vpop.f32.mrf.mxu0 }
 0x9e0   : > { %v1503_v59 = vsel %vm984_vm4, %v1497_v57, -inf }
 0x9e1   : > { %1504 = vmax.xlane.f32.xlu0 %v1503_v59 }
 0xa66   : > { %v1502_v60 = vpop.xlane.xlu1 %1501 }
 0xa67   : > { %v1506_v61 = vsub.f32 %v1494_v52, %v1502_v60 }
 0xa69   : > { %v1508_v62 = vmul.f32 1.442695, %v1506_v61 }
 0xa6a   : > { %v1505_v63 = vpop.xlane.xlu0 %1504 }
 0xa6b   : > { %2683 = vpow2.f32 %v1508_v62  ;;  %v1507_v0 = vsub.f32 %v1497_v57, %v1505_v63 }
 0xa6d   : > { %v1510_v4 = vmul.f32 1.442695, %v1507_v0 }
 0xa6f   : > { %2685 = vpow2.f32 %v1510_v4 }
 0xa78   : > { %v2684_v50 = vpop.eup %2683 }
 0xa79   : > { %v1512_v6 = vsel %vm984_vm4, %v2684_v50, 0.0 }
 0xa7a   : > { %1513 = vadd.xlane.f32.xlu0 %v1512_v6 }
 0xa7c   : > { %v2686_v7 = vpop.eup %2685 }
 0xa7d   : > { %v1515_v9 = vsel %vm984_vm4, %v2686_v7, 0.0 }
 0xa7e   : > { %1516 = vadd.xlane.f32.xlu1 %v1515_v9 }
 0xa90   : > { %1523 = vrot.lane.b32.xlu0 %v3101_v47, %s2813_s20 }
 0xa98   : > { %v1440_v12 = vpop.f32.mrf.mxu1 }
 0xa99   : > { %v1447_v13 = vadd.f32 %v1440_v12, %v1270_v54  ;;  %v2346_v12 = vld [vmem:[%s783_s25] ss:$0 sm:$0xff] }
 0xa9a   : > { %v2487_v14 = vpop.f32.mrf.mxu1 }
 0xa9c   : > { %v1443_v16 = vpop.f32.mrf.mxu1 }
 0xa9d   : > { %v1448_v17 = vadd.f32 %v1443_v16, %v1273_v15 }
 0xa9e   : > { %v2488_v18 = vpop.f32.mrf.mxu1 }
 0xa9f   : > { %v2648_v18 = vld [vmem:[%s3049_s18 + $0x30] sm:$0xff]  }
 0xb03   : > { %v1514_v19 = vpop.xlane.xlu0 %1513 }
 0xb04   : > { %2687 = vrcp.f32 %v1514_v19  ;;  %v2649_v19 = vld [vmem:[%s3049_s18 + $0x28] sm:$0xff]  }
 0xb07   : > { %v1517_v20 = vpop.xlane.xlu1 %1516  ;;  %v1524_v21 = vpop.permute.xlu0 %1523 }
 0xb08   : > { %2689 = vrcp.f32 %v1517_v20  ;;  %2496 = vmatpush3.bf16.msra.mxu1 %v1524_v21  ;;  %v2650_v20 = vld [vmem:[%s3049_s18 + $0x20] sm:$0xff]   ;;  %v2651_v21 = vld [vmem:[%s3049_s18 + $0x18] sm:$0xff]  }
 0xb09   : > { %2507 = vmatprep.subr.bf16.mxu1 %v2801_v11 }
 0xb11   : > { %v2688_v47 = vpop.eup %2687 }
 0xb12   : > { %v1520_v8 = vmul.f32 %v2688_v47, %v2684_v50  ;;  %v2345_v50 = vld [vmem:[%s780_s17] ss:$0 sm:$0xff]  ;;  %v2652_v47 = vld [vmem:[%s3049_s18 + $0x10] sm:$0xff]  }
 0xb15   : > { %v2690_v1 = vpop.eup %2689 }
 0xb16   : > { %v1521_v22 = vmul.f32 %v2690_v1, %v2686_v7  ;;  %v2653_v1 = vld [vmem:[%s3049_s18 + $0x8] sm:$0xff]  }
 0xb18   : > { %v1522_v23 = vpack.c.bf16 %v1521_v22, %v1520_v8  ;;  %v2654_v8 = vld [vmem:[%s3049_s18] sm:$0xff]  }
 0xb19   : > { %v2347_v22 = vld [vmem:[%s791_s6] ss:$0 sm:$0xff] }
 0xb1a   : > { %2498 = vmatmul.mubr.msk.bf16.vlgmr.msra.gmra.mxu1 %vm984_vm4, %v1522_v23 }
 0xb1b   : > { %2511 = vmatprep.mubr.msk.bf16.mxu1 %vm2802_vm2, %v2801_v11  ;;  %2508 = vmatpush3.bf16.msra.mxu1 %v2645_v44 }
 0xb1c   : > { %2509 = vmatprep.subr.bf16.mxu1 %v2801_v11 }
 0xb1f   : > { %2510 = vmatpush3.bf16.msra.mxu1 %v2646_v45 }
 0xbda   : > { %v1563_v24 = vpop.f32.mrf.mxu1 }
 0xbdc   : > { %v2499_v25 = vpop.f32.mrf.mxu1 }
 0xbde   : > { %v1566_v26 = vpop.f32.mrf.mxu1 }
 0xbdf   : > { %v1570_v27 = vpack.c.bf16 %v1566_v26, %v1563_v24 }
 0xbe0   : > { %v2500_v28 = vpop.f32.mrf.mxu1 }
 0xbe1   : > { %2504 = vmatmul.mubr.msk.bf16.vlgmr.msra.gmra.mxu0 %vm936_vm3, %v1570_v27 }
 0xbe2   : > { %2531 = vmatprep.mubr.msk.bf16.mxu0 %vm2802_vm2, %v2801_v11 }
 0xca1   : > { %v1613_v29 = vpop.f32.mrf.mxu0 }
 0xca2   : > { %v1620_v30 = vadd.f32 %v1613_v29, %v1447_v13 }
 0xca3   : > { %v2505_v32 = vpop.f32.mrf.mxu0 }
 0xca4   : > { %v1622_v33 = vadd.f32 %v1620_v30, %v3057_v2 }
 0xca5   : > { %v1616_v34 = vpop.f32.mrf.mxu0 }
 0xca6   : > { %v3223_v35 = vadd.f32 %v2344_v31, %v1622_v33  ;;  %v1621_v36 = vadd.f32 %v1616_v34, %v1448_v17  ;;  %v2647_v17 = vld [vmem:[%s3049_s18 + $0x38] sm:$0xff]  }
 0xca7   : > { %v2506_v37 = vpop.f32.mrf.mxu0  ;;  %2516 = vmatpush3.bf16.msra.mxu0 %v2647_v17 }
 0xca8   : > { %v1623_v38 = vadd.f32 %v1621_v36, %v3059_v3  ;;  %v1635_v39 = vsel %vm816_vm1, %v3223_v35, 0.0  ;;  %v1643_v40 = vmul.f32 %v3223_v35, %v3223_v35  ;;  %2517 = vmatprep.subr.bf16.mxu0 %v2801_v11 }
 0xca9   : > { %1636 = vadd.xlane.f32.xlu1 %v1635_v39 }
 0xcaa   : > { %v3230_v41 = vadd.f32 %v2344_v31, %v1623_v38  ;;  %v1645_v2 = vsel %vm816_vm1, %v1643_v40, 0.0 }
 0xcab   : > { %2518 = vmatpush3.bf16.msra.mxu0 %v2648_v18 }
 0xcac   : > { %v1638_v42 = vsel %vm816_vm1, %v3230_v41, 0.0  ;;  %v1644_v43 = vmul.f32 %v3230_v41, %v3230_v41  ;;  %2519 = vmatprep.subr.bf16.mxu0 %v2801_v11 }
 0xcad   : > { %1646 = vadd.xlane.f32.xlu1 %v1645_v2 }
 0xcae   : > { %v1648_v3 = vsel %vm816_vm1, %v1644_v43, 0.0 }
 0xcaf   : > { %2520 = vmatpush3.bf16.msra.mxu0 %v2649_v19 }
 0xcb0   : > { %2521 = vmatprep.subr.bf16.mxu0 %v2801_v11 }
 0xcb1   : > { %1639 = vadd.xlane.f32.xlu1 %v1638_v42 }
 0xcb3   : > { %2522 = vmatpush3.bf16.msra.mxu0 %v2650_v20 }
 0xcb4   : > { %2523 = vmatprep.subr.bf16.mxu0 %v2801_v11 }
 0xcb5   : > { %1649 = vadd.xlane.f32.xlu1 %v1648_v3 }
 0xcb7   : > { %2524 = vmatpush3.bf16.msra.mxu0 %v2651_v21 }
 0xcb8   : > { %2525 = vmatprep.subr.bf16.mxu0 %v2801_v11 }
 0xcbb   : > { %2526 = vmatpush3.bf16.msra.mxu0 %v2652_v47 }
 0xcbc   : > { %2527 = vmatprep.subr.bf16.mxu0 %v2801_v11 }
 0xcbf   : > { %2528 = vmatpush3.bf16.msra.mxu0 %v2653_v1 }
 0xcc0   : > { %2529 = vmatprep.subr.bf16.mxu0 %v2801_v11 }
 0xcc3   : > { %2530 = vmatpush3.bf16.msra.mxu0 %v2654_v8 }
 0xd32   : > { %v1637_v46 = vpop.xlane.xlu1 %1636 }
 0xd33   : > { %v1641_v48 = vmul.f32 0.03125, %v1637_v46  ;;  %v2359_v46 = vld [vmem:[%s799_s23] ss:$0 sm:$0xff] }
 0xd35   : > { %v1653_v51 = vmul.f32 %v1641_v48, %v1641_v48  ;;  %v1657_v0 = vsub.f32 %v3223_v35, %v1641_v48 }
 0xd36   : > { %v1647_v49 = vpop.xlane.xlu1 %1646 }
 0xd37   : > { %v1651_v52 = vmul.f32 0.03125, %v1647_v49 }
 0xd39   : > { %v1655_v53 = vsub.f32 %v1651_v52, %v1653_v51 }
 0xd3a   : > { %v1640_v55 = vpop.xlane.xlu1 %1639 }
 0xd3b   : > { %v1659_v56 = vadd.f32 1e-05, %v1655_v53  ;;  %v1642_v57 = vmul.f32 0.03125, %v1640_v55 }
 0xd3d   : > { %2691 = vrsqrt.f32 %v1659_v56  ;;  %v1654_v59 = vmul.f32 %v1642_v57, %v1642_v57  ;;  %v1658_v6 = vsub.f32 %v3230_v41, %v1642_v57 }
 0xd3e   : > { %v1650_v58 = vpop.xlane.xlu1 %1649 }
 0xd3f   : > { %v1652_v60 = vmul.f32 0.03125, %v1650_v58 }
 0xd41   : > { %v1656_v61 = vsub.f32 %v1652_v60, %v1654_v59 }
 0xd43   : > { %v1660_v62 = vadd.f32 1e-05, %v1656_v61 }
 0xd45   : > { %2693 = vrsqrt.f32 %v1660_v62 }
 0xd4a   : > { %v2692_v63 = vpop.eup %2691 }
 0xd4b   : > { %v1663_v4 = vmul.f32 %v2692_v63, %v1657_v0 }
 0xd4d   : > { %v1671_v54 = vmul.f32 %v2345_v50, %v1663_v4 }
 0xd4f   : > { %v1679_v14 = vadd.f32 %v2346_v12, %v1671_v54 }
 0xd52   : > { %v2694_v7 = vpop.eup %2693 }
 0xd53   : > { %v1664_v9 = vmul.f32 %v2694_v7, %v1658_v6 }
 0xd55   : > { %v1672_v13 = vmul.f32 %v2345_v50, %v1664_v9 }
 0xd57   : > { %v1680_v15 = vadd.f32 %v2346_v12, %v1672_v13 }
 0xd59   : > { %v1681_v16 = vpack.c.bf16 %v1680_v15, %v1679_v14 }
 0xd5b   : > { %2512 = vmatmul.mubr.msk.bf16.vlgmr.msra.gmra.mxu1 %vm816_vm1, %v1681_v16 }
 0xe1b   : > { %v1742_v23 = vpop.f32.mrf.mxu1 }
 0xe1c   : > { %v1743_v5 = vadd.f32 %v2347_v22, %v1742_v23 }
 0xe1d   : > { %v2513_v10 = vpop.f32.mrf.mxu1 }
 0xe1e   : > { %v1751_v24 = vmul.f32 0.044715, %v1743_v5  ;;  %v1749_v40 = vmul.f32 0.5, %v1743_v5 }
 0xe1f   : > { %v1745_v25 = vpop.f32.mrf.mxu1 }
 0xe20   : > { %v1753_v26 = vmul.f32 %v1751_v24, %v1743_v5  ;;  %v1746_v27 = vadd.f32 %v2347_v22, %v1745_v25 }
 0xe21   : > { %v2514_v28 = vpop.f32.mrf.mxu1 }
 0xe22   : > { %v1755_v29 = vmul.f32 %v1753_v26, %v1743_v5  ;;  %v1752_v30 = vmul.f32 0.044715, %v1746_v27  ;;  %v1750_v2 = vmul.f32 0.5, %v1746_v27 }
 0xe24   : > { %v1757_v31 = vadd.f32 %v1755_v29, %v1743_v5  ;;  %v1754_v32 = vmul.f32 %v1752_v30, %v1746_v27 }
 0xe26   : > { %v1759_v33 = vmul.f32 0.7978846, %v1757_v31  ;;  %v1756_v11 = vmul.f32 %v1754_v32, %v1746_v27 }
 0xe28   : > { %2695 = vtanh.f32 %v1759_v33  ;;  %v1758_v34 = vadd.f32 %v1756_v11, %v1746_v27 }
 0xe2a   : > { %v1760_v36 = vmul.f32 0.7978846, %v1758_v34 }
 0xe2c   : > { %2697 = vtanh.f32 %v1760_v36 }
 0xe35   : > { %v2696_v37 = vpop.eup %2695 }
 0xe36   : > { %v1763_v38 = vadd.f32 1.0, %v2696_v37 }
 0xe38   : > { %v1765_v43 = vmul.f32 %v1763_v38, %v1749_v40 }
 0xe39   : > { %v2698_v39 = vpop.eup %2697 }
 0xe3a   : > { %v1764_v42 = vadd.f32 1.0, %v2698_v39 }
 0xe3c   : > { %v1766_v3 = vmul.f32 %v1764_v42, %v1750_v2 }
 0xe3e   : > { %v1767_v44 = vpack.c.bf16 %v1766_v3, %v1765_v43 }
 0xe40   : > { %2532 = vmatmul.mubr.bf16.vlgmr.msra.gmra.mxu0 %v1767_v44 }
 0xf00   : > { %v1866_v45 = vpop.f32.mrf.mxu0 }
 0xf01   : > { %v1873_v48 = vadd.f32 %v1866_v45, %v3223_v35 }
 0xf02   : > { %v2533_v49 = vpop.f32.mrf.mxu0 }
 0xf03   : > { %v1882_v51 = vadd.f32 %v2359_v46, %v1873_v48 }
 0xf04   : > { %v1869_v52 = vpop.f32.mrf.mxu0 }
 0xf05   : > { %1884 = vst.msk [vmem:[#allocation2] sm:$0xff] %vm816_vm1, %v1882_v51  ;;  %v1874_v53 = vadd.f32 %v1869_v52, %v3230_v41  ;;  %1889 = sbr.rel (%p2360_p2) target bundleno = 4489 (0x1189), region = 100 }
 0xf06   : > { %v2534_v55 = vpop.f32.mrf.mxu0 }
 0xf07   : > { %v1883_v56 = vadd.f32 %v2359_v46, %v1874_v53 }
 0xf09   : > { %1885 = vst.msk [vmem:[#allocation2 + $0x8] sm:$0xff] %vm816_vm1, %v1883_v56 }
 0xf0a   : > { %v1899_v57 = vpack.c.bf16 %v1883_v56, %v1882_v51  ;;  %v1890_v58 = vlaneseq  ;;  %v2814_v59 = vmov 0.0   ;;  %vm2815_vm6 = vmmov 0   ;;  %v2699_v35 = vld [vmem:[%s3433_s22 + $0x8] sm:$0xff]   ;;  %v2700_v0 = vld [vmem:[%s3433_s22] sm:$0xff]  }
 0xf0b   : > { %2535 = vmatprep.subr.bf16.mxu0 %v2814_v59  ;;  %2537 = vmatprep.mubr.msk.bf16.mxu0 %vm2815_vm6, %v2814_v59  ;;  %v2701_v4 = vld [vmem:[%s3434_s16 + $0x8] sm:$0xff]   ;;  %v2702_v12 = vld [vmem:[%s3434_s16] sm:$0xff]  }
 0xf0c   : > { %2536 = vmatpush3.bf16.msra.mxu0 %v1899_v57  ;;  %v1891_v41 = vshrl.u32 %v1890_v58, 7  ;;  %v1893_v60 = vand.u32 127, %v1890_v58  ;;  %2541 = vmatprep.subr.bf16.mxu1 %v2814_v59  ;;  %v2363_v13 = vld [vmem:[%s3435_s4] ss:$0 sm:$0xff] }
 0xf0d   : > { %2542 = vmatpush3.bf16.msra.mxu1 %v2699_v35  ;;  %2545 = vmatprep.mubr.msk.bf16.mxu1 %vm2815_vm6, %v2814_v59  ;;  %v2367_v21 = vld [vmem:[%s3436_s15] ss:$0 sm:$0xff] }
 0xf0e   : > { %v1894_v61 = vmul.u32 8, %v1891_v41  ;;  %2543 = vmatprep.subr.bf16.mxu1 %v2814_v59  ;;  %2549 = vmatprep.subr.bf16.mxu0 %v2814_v59 }
 0xf10   : > { %vm1895_vm7 = vcmp.eq.s32.totalorder %v1893_v60, %v1894_v61 }
 0xf11   : > { %v2361_v62 = vsel %vm1895_vm7, 1.0, %v2814_v59  ;;  %2544 = vmatpush3.bf16.msra.mxu1 %v2700_v0 }
 0xf12   : > { %v1898_v63 = vpack.c.bf16 %v2361_v62, %v2361_v62 }
 0xf14   : > { %2538 = vmatmul.mubr.msk.bf16.vlgmr.msra.gmra.mxu0 %vm984_vm4, %v1898_v63 }
 0xf15   : > { %2553 = vmatprep.mubr.msk.bf16.mxu0 %vm2815_vm6, %v2814_v59  ;;  %2550 = vmatpush3.bf16.msra.mxu0 %v2701_v4 }
 0xf16   : > { %2551 = vmatprep.subr.bf16.mxu0 %v2814_v59 }
 0xf19   : > { %2552 = vmatpush3.bf16.msra.mxu0 %v2702_v12 }
 0xfd4   : > { %v1937_v50 = vpop.f32.mrf.mxu0 }
 0xfd5   : > { %v1943_v6 = vpack.c.bf16 %v1937_v50, %v1937_v50 }
 0xfd6   : > { %v2539_v7 = vpop.f32.mrf.mxu0 }
 0xfd7   : > { %2546 = vmatmul.mubr.msk.bf16.vlgmr.msra.gmra.mxu1 %vm816_vm1, %v1943_v6 }
 0xfd8   : > { %v1940_v9 = vpop.f32.mrf.mxu0 }
 0xfda   : > { %v2540_v54 = vpop.f32.mrf.mxu0 }
0x1097   : > { %v2004_v14 = vpop.f32.mrf.mxu1 }
0x1098   : > { %v2005_v15 = vadd.f32 %v2363_v13, %v2004_v14 }
0x1099   : > { %v2547_v16 = vpop.f32.mrf.mxu1 }
0x109a   : > { %v2010_v17 = vmax.f32 %v2005_v15, 0.0 }
0x109b   : > { %v2007_v18 = vpop.f32.mrf.mxu1 }
0x109c   : > { %v2011_v19 = vpack.c.bf16 %v2010_v17, %v2010_v17 }
0x109d   : > { %v2548_v20 = vpop.f32.mrf.mxu1 }
0x109e   : > { %2554 = vmatmul.mubr.msk.bf16.vlgmr.msra.gmra.mxu0 %vm816_vm1, %v2011_v19 }
0x115e   : > { %v2072_v47 = vpop.f32.mrf.mxu0 }
0x115f   : > { %v2073_v1 = vadd.f32 %v2367_v21, %v2072_v47 }
0x1160   : > { %v2555_v8 = vpop.f32.mrf.mxu0 }
0x1161   : > { %v2078_v22 = vand.u32 2147483647, %v2073_v1  ;;  %vm2084_vm8 = vcmp.ge.f32.partialorder %v2073_v1, 0.0 }
0x1162   : > { %v2075_v23 = vpop.f32.mrf.mxu0 }
0x1163   : > { %v2079_v5 = vsub.f32 0.0, %v2078_v22 }
0x1164   : > { %v2556_v10 = vpop.f32.mrf.mxu0 }
0x1165   : > { %v2080_v24 = vmul.f32 1.442695, %v2079_v5 }
0x1167   : > { %2703 = vpow2.f32 %v2080_v24 }
0x1174   : > { %v2704_v25 = vpop.eup %2703 }
0x1175   : > { %v2082_v26 = vadd.f32 1.0, %v2704_v25 }
0x1177   : > { %2705 = vrcp.f32 %v2082_v26 }
0x1184   : > { %v2706_v27 = vpop.eup %2705 }
0x1185   : > { %v2085_v28 = vmul.f32 %v2706_v27, %v2704_v25 }
0x1187   : > { %v2086_v29 = vsel %vm2084_vm8, %v2706_v27, %v2085_v28 }
0x1188   : > { %2087 = vst [vmem:[%s744_s24] sm:$0x3] %v2086_v29 }
0x1189 PF: > { %s3437_s17 = sld [smem:[#allocation9_spill]]  ;;  %s2102_s19 = sshll.u32 %s744_s24, 4  ;;  %s2103_s19 = int_to_ptr.vmem [resolvable:$true] %s2102_s19 }
0x118a   : > { %s3438_s25 = sld [smem:[#allocation7_spill]]  ;;  %s2707_s14 = scalar_lea.vmem %s2103_s19, 32 }
0x118b   : > { %s3440_s30 = sld [smem:[#allocation29_spill]]  ;;  %p2708_p4 = scmp.ne.s32.totalorder %s2103_s19, %s2707_s14 }
0x118c   : > { %s2816_s29 = smov [#allocation3]  }
0x118d   : > { %p2709_p5 = pnand %p2708_p4, %p2961_p3  ;;  %s2711_s4 = sshll.u32 %s2816_s29, 4  ;;  %s2712_s4 = int_to_ptr.vmem [resolvable:$false] %s2711_s4 }
0x118e   : > { %s2713_s2 = scalar_lea.vmem %s2712_s4, 64  ;;  %p2714_p7 = scmp.lt.s32.totalorder %s2103_s19, %s2712_s4 }
0x118f   : > { %s2372_s18 = sshll.u32 %s3437_s17, 5  ;;  %p2710_p6 = pneg %p2709_p5 }
0x1190   : > { %s3442_s20 = sand.u32 1, %s3438_s25   ;;  %p2715_p8 = scmp.lt.s32.totalorder %s2713_s2, %s2707_s14 }
0x1191   : > { %s3441_s21 = smov %s3440_s30  ;;  %s2100_s0 = scalar_lea.hbm %s3440_s30, %s2372_s18 }
0x1192   : > { %s2089_s1 = scalar_lea.sflag [#allocation4], %s3442_s20  ;;  %p2716_p10 = por %p2715_p8, %p2714_p7 }
0x1194   : > { %p2717_p11 = pnand %p2716_p10, %p2710_p6 }
0x1196   : > { %2720 = shalt.err (!%p2717_p11)
}
0x1197   : > { %s2721_s26 = scalar_lea.hbm %s2100_s0, 32  ;;  %s2725_s15 = scalar_lea.hbm %s3441_s21, 64 }
0x1198   : > { %p2722_p12 = scmp.ne.s32.totalorder %s2100_s0, %s2721_s26  ;;  %p2726_p1 = scmp.lt.s32.totalorder %s2100_s0, %s3441_s21 }
0x1199   : > { %p2727_p2 = scmp.lt.s32.totalorder %s2725_s15, %s2721_s26 }
0x119a   : > { %p2723_p13 = pnand %p2722_p12, %p2961_p3 }
0x119b   : > { %p2728_p4 = por %p2727_p2, %p2726_p1 }
0x119c   : > { %p2724_p0 = pneg %p2723_p13 }
0x119e   : > { %p2729_p5 = pnand %p2728_p4, %p2724_p0 }
0x11a0   : > { %2732 = shalt.err (!%p2729_p5)
}
0x11a1   : > { %2557 = dma.vmem_to_hbm [thread:$0]  (%p2961_p3), %s2103_s19, 32, %s2100_s0, %s2089_s1  }
0x11a2 PF: > { %s3443_s18 = sld [smem:[#allocation12_spill]] }
0x11a3   : > { %s3444_s28 = sld [smem:[#allocation6_spill]] }
0x11a8   : > { %p2563_p6 = scmp.ge.s32.totalorder %s3443_s18, 2 }
0x11a9   : > { %s2114_s30 = sand.u32 1, %s3444_s28  }
0x11aa   : > { %p2560_p7 = pnand %p2563_p6, %p2971_p9  ;;  %s2115_s20 = scalar_lea.sflag [#allocation4], %s2114_s30 }
0x11ac   : > { %p2561_p8 = pneg %p2560_p7 }
0x11ae   : > { %2766 = dma.done.wait (%p2561_p8), %s2115_s20, 32  }
0x11af   : > { %2768 = vsyncadd (%p2561_p8), %s2115_s20, 4294967264  ;;  %s31_s20 = sadd.s32 1, %s3443_s18   ;;  %s3446_s27 = sld [smem:[#allocation7_spill]] }
0x11b0   : > { %p28_p10 = scmp.ge.s32.totalorder %s31_s20, 6   ;;  %s3447_s28 = sld [smem:[#allocation8_spill]] }
0x11b1   : > { %s3448_s29 = sld [smem:[#allocation17_spill]] }
0x11b2   : > { %s3449_s30 = sld [smem:[#allocation10_spill]]  ;;  %30 = sbr.rel (!%p28_p10) target bundleno = 16 (0x10), region = 177 }
0x11b3   : > { %s3450_s0 = sld [smem:[#allocation11_spill]] }
0x11b4   : > { %s3451_s19 = sld [smem:[#allocation13_spill]] }
0x11b5   : > { %s3452_s1 = sld [smem:[#allocation15_spill]] }
0x11b7   :  { %2120 = vsyncpa [#allocation4], 1 }
0x11b8   :  { %2122 = vsyncpa [#allocation4 + $0x1], 1 }

</bundles_post_ra>
